<compile_context>
chip_gen: v7x
topology: tpu7x:2x2x1
jax: 0.10.0
libtpu: 0.0.40
codegen_flags: <defaults>
</compile_context>

<pallas_src>
import jax
import jax.numpy as jnp
import numpy as np
from jax.experimental import pallas as pl
from jax.experimental.pallas import tpu as pltpu

# ----------------------------- model sizes -----------------------------------
VOCAB_SRC = 20     # english vocab (encoder input)
EMB = 16           # embedding size
HIDDEN = 32        # LSTM hidden size (4*HIDDEN == 128 -> gates fill one lane span)
S_SRC = 8          # source sequence length
BATCH = 2
SUBLANE = 8        # f32 sublane tile; batch is padded up to this inside the jit

_VMEM = pl.BlockSpec(memory_space=pltpu.MemorySpace.VMEM)


def _round_up(x, m):
    return ((x + m - 1) // m) * m


# ----------------------------- fused Pallas kernel ----------------------------
def _encoder_kernel(ids_ref, tw_ref, whh_ref, wfc_ref, bfc_ref,
                    enc_ref, hc_ref):
    """Whole encoder in one invocation (no grid).

    ids: (S*Np, 1) int32 token ids (padded batch rows carry id 0, sliced off later)
    tw : (2, Vp, 4H)  = emb_table @ W_ih[d] + b[d], vocab padded to Vp
    whh: (2, H, 4H)   recurrent weights
    wfc: (4H, 2H)     block-diagonal fused fc_hidden/fc_cell weight
    bfc: (1, 2H)      [fc_hidden_b | fc_cell_b]
    enc: (S*Np, 2H)   encoder_states slab (time-major)
    hc : (Np, 2H)     [fc_hidden(h) | fc_cell(c)]
    """
    SNp, twoH = enc_ref.shape
    Np = hc_ref.shape[0]
    S = SNp // Np
    H = twoH // 2
    Vp = tw_ref.shape[1]

    # --- embedding gather + input projection, hoisted out of the recurrence ---
    ids = ids_ref[...]                                             # (S*Np, 1) i32
    iota = jax.lax.broadcasted_iota(jnp.int32, (SNp, Vp), 1)
    onehot = (iota == ids).astype(jnp.float32)                     # (S*Np, Vp)
    xw_f = jnp.dot(onehot, tw_ref[0], preferred_element_type=jnp.float32)  # (S*Np, 4H)
    xw_b = jnp.dot(onehot, tw_ref[1], preferred_element_type=jnp.float32)

    whh_f = whh_ref[0]
    whh_b = whh_ref[1]

    def run_direction(xw, whh, time_order):
        h = jnp.zeros((Np, H), jnp.float32)
        c = jnp.zeros((Np, H), jnp.float32)
        hs = [None] * S
        for t in time_order:                       # static, fully unrolled
            gates = xw[t * Np:(t + 1) * Np, :] + jnp.dot(
                h, whh, preferred_element_type=jnp.float32)        # (Np, 4H)
            sg = jax.nn.sigmoid(gates)   # 1 full-vreg EUP pass (i, f, o lanes used)
            th = jnp.tanh(gates)         # 1 full-vreg EUP pass (g lanes used)
            i = sg[:, 0 * H:1 * H]
            f = sg[:, 1 * H:2 * H]
            g = th[:, 2 * H:3 * H]
            o = sg[:, 3 * H:4 * H]
            c = f * c + i * g
            h = o * jnp.tanh(c)
            hs[t] = h                    # indexed by input timestep
        return hs, h, c

    hs_f, hf, cf = run_direction(xw_f, whh_f, range(S))
    hs_b, hb, cb = run_direction(xw_b, whh_b, range(S - 1, -1, -1))

    # --- encoder_states: one slab store (S*Np, 2H), already in time order ----
    fwd = jnp.concatenate(hs_f, axis=0)            # (S*Np, H)
    bwd = jnp.concatenate(hs_b, axis=0)            # (S*Np, H)
    enc_ref[...] = jnp.concatenate([fwd, bwd], axis=1)

    # --- fused fc_hidden / fc_cell: x fills all 4H = 128 lanes ----------------
    x = jnp.concatenate([hf, hb, cf, cb], axis=1)  # (Np, 4H) = [h_f h_b c_f c_b]
    hc_ref[...] = (jnp.dot(x, wfc_ref[...], preferred_element_type=jnp.float32)
                   + bfc_ref[...])                 # (Np, 2H): [hidden | cell]


# ----------------------------- params ------------------------------------------
def init_params(key):
    def nrm(k, shape, scale=0.1):
        return scale * jax.random.normal(k, shape, dtype=jnp.float32)

    ks = jax.random.split(key, 11)
    H = HIDDEN
    return {
        "enc_emb": nrm(ks[0], (VOCAB_SRC, EMB)),
        "enc_wih_f": nrm(ks[1], (EMB, 4 * H)),
        "enc_whh_f": nrm(ks[2], (H, 4 * H)),
        "enc_b_f": nrm(ks[3], (1, 4 * H)),
        "enc_wih_b": nrm(ks[4], (EMB, 4 * H)),
        "enc_whh_b": nrm(ks[5], (H, 4 * H)),
        "enc_b_b": nrm(ks[6], (1, 4 * H)),
        "fc_hidden_w": nrm(ks[7], (2 * H, H)),
        "fc_hidden_b": nrm(ks[8], (1, H)),
        "fc_cell_w": nrm(ks[9], (2 * H, H)),
        "fc_cell_b": nrm(ks[10], (1, H)),
    }


def prepare_params(params):
    """One-time packing for the fused kernel (runs OUTSIDE the jitted forward)."""
    H = HIDDEN
    P = jax.lax.Precision.HIGHEST
    Vp = _round_up(VOCAB_SRC, SUBLANE)

    def fold(wih, b):
        # TODO(synk): nn.Dropout(p) on the embedding is treated as identity
        # (eval mode); a training-mode dropout cannot be folded this way.
        tw = jnp.dot(params["enc_emb"], wih, precision=P) + b      # (V, 4H)
        return jnp.pad(tw, ((0, Vp - VOCAB_SRC), (0, 0)))          # (Vp, 4H)

    tw = jnp.stack([fold(params["enc_wih_f"], params["enc_b_f"]),
                    fold(params["enc_wih_b"], params["enc_b_b"])])  # (2, Vp, 4H)
    whh = jnp.stack([params["enc_whh_f"], params["enc_whh_b"]])     # (2, H, 4H)

    # block-diagonal fused fc weight; rows match x = [h_f | h_b | c_f | c_b]
    w_fc = jnp.zeros((4 * H, 2 * H), jnp.float32)
    w_fc = w_fc.at[:2 * H, :H].set(params["fc_hidden_w"])
    w_fc = w_fc.at[2 * H:, H:].set(params["fc_cell_w"])
    b_fc = jnp.concatenate([params["fc_hidden_b"], params["fc_cell_b"]], axis=1)
    return {"tw": tw, "whh": whh, "w_fc": w_fc, "b_fc": b_fc}


# ----------------------------- jitted forward ----------------------------------
@jax.jit
def encoder_forward(packed, source):
    """source: (S, N) int32 token ids -> (encoder_states, hidden, cell)."""
    S, N = source.shape
    H = HIDDEN
    Np = _round_up(max(N, SUBLANE), SUBLANE)
    # only pre-kernel work: pad the tiny id matrix to a full sublane tile
    ids = jnp.pad(source.astype(jnp.int32), ((0, 0), (0, Np - N)))
    ids = ids.reshape(S * Np, 1)

    enc_flat, hc = pl.pallas_call(
        _encoder_kernel,
        out_shape=(jax.ShapeDtypeStruct((S * Np, 2 * H), jnp.float32),
                   jax.ShapeDtypeStruct((Np, 2 * H), jnp.float32)),
        in_specs=[_VMEM] * 5,
        out_specs=(_VMEM, _VMEM),
    )(ids, packed["tw"], packed["whh"], packed["w_fc"], packed["b_fc"])

    encoder_states = enc_flat.reshape(S, Np, 2 * H)[:, :N, :]       # (S, N, 2H)
    hidden = hc[:N, :H][None]                                       # (1, N, H)
    cell = hc[:N, H:][None]                                         # (1, N, H)
    return encoder_states, hidden, cell


# ----------------------------- pure-JAX reference ------------------------------
def encoder_reference(params, source):
    P = jax.lax.Precision.HIGHEST
    H = HIDDEN
    emb = jnp.take(params["enc_emb"], source, axis=0)
    S, N, _ = emb.shape

    def cell_step(x, h, c, wih, whh, b):
        gates = (jnp.dot(x, wih, precision=P) + jnp.dot(h, whh, precision=P) + b)
        i = jax.nn.sigmoid(gates[:, 0 * H:1 * H])
        f = jax.nn.sigmoid(gates[:, 1 * H:2 * H])
        g = jnp.tanh(gates[:, 2 * H:3 * H])
        o = jax.nn.sigmoid(gates[:, 3 * H:4 * H])
        c2 = f * c + i * g
        return o * jnp.tanh(c2), c2

    h_f = jnp.zeros((N, H), jnp.float32); c_f = jnp.zeros((N, H), jnp.float32)
    hs_f = []
    for t in range(S):
        h_f, c_f = cell_step(emb[t], h_f, c_f, params["enc_wih_f"],
                             params["enc_whh_f"], params["enc_b_f"])
        hs_f.append(h_f)
    h_b = jnp.zeros((N, H), jnp.float32); c_b = jnp.zeros((N, H), jnp.float32)
    hs_b = [None] * S
    for t in range(S - 1, -1, -1):
        h_b, c_b = cell_step(emb[t], h_b, c_b, params["enc_wih_b"],
                             params["enc_whh_b"], params["enc_b_b"])
        hs_b[t] = h_b
    enc_states = jnp.stack(
        [jnp.concatenate([hs_f[t], hs_b[t]], axis=1) for t in range(S)], axis=0)
    hidden = (jnp.dot(jnp.concatenate([h_f, h_b], axis=1),
                      params["fc_hidden_w"], precision=P) + params["fc_hidden_b"])
    cell = (jnp.dot(jnp.concatenate([c_f, c_b], axis=1),
                    params["fc_cell_w"], precision=P) + params["fc_cell_b"])
    return enc_states, hidden[None], cell[None]


# ----------------------------- demo --------------------------------------------
if __name__ == "__main__":
    key = jax.random.PRNGKey(0)
    kp, ks = jax.random.split(key, 2)

    params = init_params(kp)
    packed = prepare_params(params)          # one-time packing, outside the jit
    source = jax.random.randint(ks, (S_SRC, BATCH), 0, VOCAB_SRC, dtype=jnp.int32)

    enc_states, hidden, cell = encoder_forward(packed, source)
    enc_states, hidden, cell = jax.block_until_ready((enc_states, hidden, cell))

    assert enc_states.shape == (S_SRC, BATCH, 2 * HIDDEN)
    assert hidden.shape == (1, BATCH, HIDDEN)
    assert cell.shape == (1, BATCH, HIDDEN)
    assert bool(jnp.all(jnp.isfinite(enc_states)))
    assert bool(jnp.all(jnp.isfinite(hidden)))
    assert bool(jnp.all(jnp.isfinite(cell)))

    ref_enc, ref_h, ref_c = encoder_reference(params, source)
    np.testing.assert_allclose(np.asarray(enc_states), np.asarray(ref_enc),
                               rtol=2e-3, atol=2e-3)
    np.testing.assert_allclose(np.asarray(hidden), np.asarray(ref_h),
                               rtol=2e-3, atol=2e-3)
    np.testing.assert_allclose(np.asarray(cell), np.asarray(ref_c),
                               rtol=2e-3, atol=2e-3)

    print("KERNEL_OK")
</pallas_src>

<mosaic_0001>
module attributes {stable_mosaic.version = 11 : i64} {
  func.func @_encoder_kernel(%arg0: memref<64x1xi32, #tpu.memory_space<vmem>>, %arg1: memref<2x24x128xf32, #tpu.memory_space<vmem>>, %arg2: memref<2x32x128xf32, #tpu.memory_space<vmem>>, %arg3: memref<128x64xf32, #tpu.memory_space<vmem>>, %arg4: memref<1x64xf32, #tpu.memory_space<vmem>>, %arg5: memref<64x64xf32, #tpu.memory_space<vmem>>, %arg6: memref<8x64xf32, #tpu.memory_space<vmem>>) attributes {dimension_semantics = [], scalar_prefetch = 0 : i64, scratch_operands = 0 : i64, tpu.core_type = #tpu.core_type<tc>} {
    %c0 = arith.constant 0 : index
    %c0_0 = arith.constant 0 : index
    %0 = vector.load %arg0[%c0, %c0_0] : memref<64x1xi32, #tpu.memory_space<vmem>>, vector<64x1xi32>
    %1 = tpu.iota {dimensions = array<i32: 1>} : vector<64x24xi32>
    %2 = vector.broadcast %0 : vector<64x1xi32> to vector<64x24xi32>
    %3 = arith.cmpi eq, %1, %2 : vector<64x24xi32>
    %4 = arith.extui %3 : vector<64x24xi1> to vector<64x24xi32>
    %5 = arith.sitofp %4 : vector<64x24xi32> to vector<64x24xf32>
    %c0_1 = arith.constant 0 : index
    %c0_2 = arith.constant 0 : index
    %c0_3 = arith.constant 0 : index
    %6 = vector.load %arg1[%c0_1, %c0_2, %c0_3] : memref<2x24x128xf32, #tpu.memory_space<vmem>>, vector<1x24x128xf32>
    %7 = vector.shape_cast %6 : vector<1x24x128xf32> to vector<24x128xf32>
    %cst = arith.constant dense<0.000000e+00> : vector<64x128xf32>
    %8 = tpu.matmul %5, %7, %cst {dimension_numbers = #tpu.dot_dimension_numbers<[1], [0], [0], [1], [0, 0, 1, 1], [], []>} : vector<64x24xf32>, vector<24x128xf32>, vector<64x128xf32> -> vector<64x128xf32>
    %c1 = arith.constant 1 : index
    %c0_4 = arith.constant 0 : index
    %c0_5 = arith.constant 0 : index
    %9 = vector.load %arg1[%c1, %c0_4, %c0_5] : memref<2x24x128xf32, #tpu.memory_space<vmem>>, vector<1x24x128xf32>
    %10 = vector.shape_cast %9 : vector<1x24x128xf32> to vector<24x128xf32>
    %cst_6 = arith.constant dense<0.000000e+00> : vector<64x128xf32>
    %11 = tpu.matmul %5, %10, %cst_6 {dimension_numbers = #tpu.dot_dimension_numbers<[1], [0], [0], [1], [0, 0, 1, 1], [], []>} : vector<64x24xf32>, vector<24x128xf32>, vector<64x128xf32> -> vector<64x128xf32>
    %c0_7 = arith.constant 0 : index
    %c0_8 = arith.constant 0 : index
    %c0_9 = arith.constant 0 : index
    %12 = vector.load %arg2[%c0_7, %c0_8, %c0_9] : memref<2x32x128xf32, #tpu.memory_space<vmem>>, vector<1x32x128xf32>
    %13 = vector.shape_cast %12 : vector<1x32x128xf32> to vector<32x128xf32>
    %c1_10 = arith.constant 1 : index
    %c0_11 = arith.constant 0 : index
    %c0_12 = arith.constant 0 : index
    %14 = vector.load %arg2[%c1_10, %c0_11, %c0_12] : memref<2x32x128xf32, #tpu.memory_space<vmem>>, vector<1x32x128xf32>
    %15 = vector.shape_cast %14 : vector<1x32x128xf32> to vector<32x128xf32>
    %cst_13 = arith.constant 0.000000e+00 : f32
    %16 = vector.broadcast %cst_13 : f32 to vector<8x32xf32>
    %cst_14 = arith.constant 0.000000e+00 : f32
    %17 = vector.broadcast %cst_14 : f32 to vector<8x32xf32>
    %18 = vector.extract_strided_slice %8 {offsets = [0, 0], sizes = [8, 128], strides = [1, 1]} : vector<64x128xf32> to vector<8x128xf32>
    %cst_15 = arith.constant dense<0.000000e+00> : vector<8x128xf32>
    %19 = tpu.matmul %16, %13, %cst_15 {dimension_numbers = #tpu.dot_dimension_numbers<[1], [0], [0], [1], [0, 0, 1, 1], [], []>} : vector<8x32xf32>, vector<32x128xf32>, vector<8x128xf32> -> vector<8x128xf32>
    %20 = arith.addf %18, %19 : vector<8x128xf32>
    %21 = arith.negf %20 : vector<8x128xf32>
    %22 = math.exp %21 : vector<8x128xf32>
    %cst_16 = arith.constant 1.000000e+00 : f32
    %23 = vector.broadcast %cst_16 : f32 to vector<8x128xf32>
    %24 = arith.addf %23, %22 : vector<8x128xf32>
    %25 = arith.divf %23, %24 : vector<8x128xf32>
    %26 = math.tanh %20 : vector<8x128xf32>
    %27 = vector.extract_strided_slice %25 {offsets = [0, 0], sizes = [8, 32], strides = [1, 1]} : vector<8x128xf32> to vector<8x32xf32>
    %28 = vector.extract_strided_slice %25 {offsets = [0, 32], sizes = [8, 32], strides = [1, 1]} : vector<8x128xf32> to vector<8x32xf32>
    %29 = vector.extract_strided_slice %26 {offsets = [0, 64], sizes = [8, 32], strides = [1, 1]} : vector<8x128xf32> to vector<8x32xf32>
    %30 = vector.extract_strided_slice %25 {offsets = [0, 96], sizes = [8, 32], strides = [1, 1]} : vector<8x128xf32> to vector<8x32xf32>
    %31 = arith.mulf %28, %17 : vector<8x32xf32>
    %32 = arith.mulf %27, %29 : vector<8x32xf32>
    %33 = arith.addf %31, %32 : vector<8x32xf32>
    %34 = math.tanh %33 : vector<8x32xf32>
    %35 = arith.mulf %30, %34 : vector<8x32xf32>
    %36 = vector.extract_strided_slice %8 {offsets = [8, 0], sizes = [8, 128], strides = [1, 1]} : vector<64x128xf32> to vector<8x128xf32>
    %cst_17 = arith.constant dense<0.000000e+00> : vector<8x128xf32>
    %37 = tpu.matmul %35, %13, %cst_17 {dimension_numbers = #tpu.dot_dimension_numbers<[1], [0], [0], [1], [0, 0, 1, 1], [], []>} : vector<8x32xf32>, vector<32x128xf32>, vector<8x128xf32> -> vector<8x128xf32>
    %38 = arith.addf %36, %37 : vector<8x128xf32>
    %39 = arith.negf %38 : vector<8x128xf32>
    %40 = math.exp %39 : vector<8x128xf32>
    %cst_18 = arith.constant 1.000000e+00 : f32
    %41 = vector.broadcast %cst_18 : f32 to vector<8x128xf32>
    %42 = arith.addf %41, %40 : vector<8x128xf32>
    %43 = arith.divf %41, %42 : vector<8x128xf32>
    %44 = math.tanh %38 : vector<8x128xf32>
    %45 = vector.extract_strided_slice %43 {offsets = [0, 0], sizes = [8, 32], strides = [1, 1]} : vector<8x128xf32> to vector<8x32xf32>
    %46 = vector.extract_strided_slice %43 {offsets = [0, 32], sizes = [8, 32], strides = [1, 1]} : vector<8x128xf32> to vector<8x32xf32>
    %47 = vector.extract_strided_slice %44 {offsets = [0, 64], sizes = [8, 32], strides = [1, 1]} : vector<8x128xf32> to vector<8x32xf32>
    %48 = vector.extract_strided_slice %43 {offsets = [0, 96], sizes = [8, 32], strides = [1, 1]} : vector<8x128xf32> to vector<8x32xf32>
    %49 = arith.mulf %46, %33 : vector<8x32xf32>
    %50 = arith.mulf %45, %47 : vector<8x32xf32>
    %51 = arith.addf %49, %50 : vector<8x32xf32>
    %52 = math.tanh %51 : vector<8x32xf32>
    %53 = arith.mulf %48, %52 : vector<8x32xf32>
    %54 = vector.extract_strided_slice %8 {offsets = [16, 0], sizes = [8, 128], strides = [1, 1]} : vector<64x128xf32> to vector<8x128xf32>
    %cst_19 = arith.constant dense<0.000000e+00> : vector<8x128xf32>
    %55 = tpu.matmul %53, %13, %cst_19 {dimension_numbers = #tpu.dot_dimension_numbers<[1], [0], [0], [1], [0, 0, 1, 1], [], []>} : vector<8x32xf32>, vector<32x128xf32>, vector<8x128xf32> -> vector<8x128xf32>
    %56 = arith.addf %54, %55 : vector<8x128xf32>
    %57 = arith.negf %56 : vector<8x128xf32>
    %58 = math.exp %57 : vector<8x128xf32>
    %cst_20 = arith.constant 1.000000e+00 : f32
    %59 = vector.broadcast %cst_20 : f32 to vector<8x128xf32>
    %60 = arith.addf %59, %58 : vector<8x128xf32>
    %61 = arith.divf %59, %60 : vector<8x128xf32>
    %62 = math.tanh %56 : vector<8x128xf32>
    %63 = vector.extract_strided_slice %61 {offsets = [0, 0], sizes = [8, 32], strides = [1, 1]} : vector<8x128xf32> to vector<8x32xf32>
    %64 = vector.extract_strided_slice %61 {offsets = [0, 32], sizes = [8, 32], strides = [1, 1]} : vector<8x128xf32> to vector<8x32xf32>
    %65 = vector.extract_strided_slice %62 {offsets = [0, 64], sizes = [8, 32], strides = [1, 1]} : vector<8x128xf32> to vector<8x32xf32>
    %66 = vector.extract_strided_slice %61 {offsets = [0, 96], sizes = [8, 32], strides = [1, 1]} : vector<8x128xf32> to vector<8x32xf32>
    %67 = arith.mulf %64, %51 : vector<8x32xf32>
    %68 = arith.mulf %63, %65 : vector<8x32xf32>
    %69 = arith.addf %67, %68 : vector<8x32xf32>
    %70 = math.tanh %69 : vector<8x32xf32>
    %71 = arith.mulf %66, %70 : vector<8x32xf32>
    %72 = vector.extract_strided_slice %8 {offsets = [24, 0], sizes = [8, 128], strides = [1, 1]} : vector<64x128xf32> to vector<8x128xf32>
    %cst_21 = arith.constant dense<0.000000e+00> : vector<8x128xf32>
    %73 = tpu.matmul %71, %13, %cst_21 {dimension_numbers = #tpu.dot_dimension_numbers<[1], [0], [0], [1], [0, 0, 1, 1], [], []>} : vector<8x32xf32>, vector<32x128xf32>, vector<8x128xf32> -> vector<8x128xf32>
    %74 = arith.addf %72, %73 : vector<8x128xf32>
    %75 = arith.negf %74 : vector<8x128xf32>
    %76 = math.exp %75 : vector<8x128xf32>
    %cst_22 = arith.constant 1.000000e+00 : f32
    %77 = vector.broadcast %cst_22 : f32 to vector<8x128xf32>
    %78 = arith.addf %77, %76 : vector<8x128xf32>
    %79 = arith.divf %77, %78 : vector<8x128xf32>
    %80 = math.tanh %74 : vector<8x128xf32>
    %81 = vector.extract_strided_slice %79 {offsets = [0, 0], sizes = [8, 32], strides = [1, 1]} : vector<8x128xf32> to vector<8x32xf32>
    %82 = vector.extract_strided_slice %79 {offsets = [0, 32], sizes = [8, 32], strides = [1, 1]} : vector<8x128xf32> to vector<8x32xf32>
    %83 = vector.extract_strided_slice %80 {offsets = [0, 64], sizes = [8, 32], strides = [1, 1]} : vector<8x128xf32> to vector<8x32xf32>
    %84 = vector.extract_strided_slice %79 {offsets = [0, 96], sizes = [8, 32], strides = [1, 1]} : vector<8x128xf32> to vector<8x32xf32>
    %85 = arith.mulf %82, %69 : vector<8x32xf32>
    %86 = arith.mulf %81, %83 : vector<8x32xf32>
    %87 = arith.addf %85, %86 : vector<8x32xf32>
    %88 = math.tanh %87 : vector<8x32xf32>
    %89 = arith.mulf %84, %88 : vector<8x32xf32>
    %90 = vector.extract_strided_slice %8 {offsets = [32, 0], sizes = [8, 128], strides = [1, 1]} : vector<64x128xf32> to vector<8x128xf32>
    %cst_23 = arith.constant dense<0.000000e+00> : vector<8x128xf32>
    %91 = tpu.matmul %89, %13, %cst_23 {dimension_numbers = #tpu.dot_dimension_numbers<[1], [0], [0], [1], [0, 0, 1, 1], [], []>} : vector<8x32xf32>, vector<32x128xf32>, vector<8x128xf32> -> vector<8x128xf32>
    %92 = arith.addf %90, %91 : vector<8x128xf32>
    %93 = arith.negf %92 : vector<8x128xf32>
    %94 = math.exp %93 : vector<8x128xf32>
    %cst_24 = arith.constant 1.000000e+00 : f32
    %95 = vector.broadcast %cst_24 : f32 to vector<8x128xf32>
    %96 = arith.addf %95, %94 : vector<8x128xf32>
    %97 = arith.divf %95, %96 : vector<8x128xf32>
    %98 = math.tanh %92 : vector<8x128xf32>
    %99 = vector.extract_strided_slice %97 {offsets = [0, 0], sizes = [8, 32], strides = [1, 1]} : vector<8x128xf32> to vector<8x32xf32>
    %100 = vector.extract_strided_slice %97 {offsets = [0, 32], sizes = [8, 32], strides = [1, 1]} : vector<8x128xf32> to vector<8x32xf32>
    %101 = vector.extract_strided_slice %98 {offsets = [0, 64], sizes = [8, 32], strides = [1, 1]} : vector<8x128xf32> to vector<8x32xf32>
    %102 = vector.extract_strided_slice %97 {offsets = [0, 96], sizes = [8, 32], strides = [1, 1]} : vector<8x128xf32> to vector<8x32xf32>
    %103 = arith.mulf %100, %87 : vector<8x32xf32>
    %104 = arith.mulf %99, %101 : vector<8x32xf32>
    %105 = arith.addf %103, %104 : vector<8x32xf32>
    %106 = math.tanh %105 : vector<8x32xf32>
    %107 = arith.mulf %102, %106 : vector<8x32xf32>
    %108 = vector.extract_strided_slice %8 {offsets = [40, 0], sizes = [8, 128], strides = [1, 1]} : vector<64x128xf32> to vector<8x128xf32>
    %cst_25 = arith.constant dense<0.000000e+00> : vector<8x128xf32>
    %109 = tpu.matmul %107, %13, %cst_25 {dimension_numbers = #tpu.dot_dimension_numbers<[1], [0], [0], [1], [0, 0, 1, 1], [], []>} : vector<8x32xf32>, vector<32x128xf32>, vector<8x128xf32> -> vector<8x128xf32>
    %110 = arith.addf %108, %109 : vector<8x128xf32>
    %111 = arith.negf %110 : vector<8x128xf32>
    %112 = math.exp %111 : vector<8x128xf32>
    %cst_26 = arith.constant 1.000000e+00 : f32
    %113 = vector.broadcast %cst_26 : f32 to vector<8x128xf32>
    %114 = arith.addf %113, %112 : vector<8x128xf32>
    %115 = arith.divf %113, %114 : vector<8x128xf32>
    %116 = math.tanh %110 : vector<8x128xf32>
    %117 = vector.extract_strided_slice %115 {offsets = [0, 0], sizes = [8, 32], strides = [1, 1]} : vector<8x128xf32> to vector<8x32xf32>
    %118 = vector.extract_strided_slice %115 {offsets = [0, 32], sizes = [8, 32], strides = [1, 1]} : vector<8x128xf32> to vector<8x32xf32>
    %119 = vector.extract_strided_slice %116 {offsets = [0, 64], sizes = [8, 32], strides = [1, 1]} : vector<8x128xf32> to vector<8x32xf32>
    %120 = vector.extract_strided_slice %115 {offsets = [0, 96], sizes = [8, 32], strides = [1, 1]} : vector<8x128xf32> to vector<8x32xf32>
    %121 = arith.mulf %118, %105 : vector<8x32xf32>
    %122 = arith.mulf %117, %119 : vector<8x32xf32>
    %123 = arith.addf %121, %122 : vector<8x32xf32>
    %124 = math.tanh %123 : vector<8x32xf32>
    %125 = arith.mulf %120, %124 : vector<8x32xf32>
    %126 = vector.extract_strided_slice %8 {offsets = [48, 0], sizes = [8, 128], strides = [1, 1]} : vector<64x128xf32> to vector<8x128xf32>
    %cst_27 = arith.constant dense<0.000000e+00> : vector<8x128xf32>
    %127 = tpu.matmul %125, %13, %cst_27 {dimension_numbers = #tpu.dot_dimension_numbers<[1], [0], [0], [1], [0, 0, 1, 1], [], []>} : vector<8x32xf32>, vector<32x128xf32>, vector<8x128xf32> -> vector<8x128xf32>
    %128 = arith.addf %126, %127 : vector<8x128xf32>
    %129 = arith.negf %128 : vector<8x128xf32>
    %130 = math.exp %129 : vector<8x128xf32>
    %cst_28 = arith.constant 1.000000e+00 : f32
    %131 = vector.broadcast %cst_28 : f32 to vector<8x128xf32>
    %132 = arith.addf %131, %130 : vector<8x128xf32>
    %133 = arith.divf %131, %132 : vector<8x128xf32>
    %134 = math.tanh %128 : vector<8x128xf32>
    %135 = vector.extract_strided_slice %133 {offsets = [0, 0], sizes = [8, 32], strides = [1, 1]} : vector<8x128xf32> to vector<8x32xf32>
    %136 = vector.extract_strided_slice %133 {offsets = [0, 32], sizes = [8, 32], strides = [1, 1]} : vector<8x128xf32> to vector<8x32xf32>
    %137 = vector.extract_strided_slice %134 {offsets = [0, 64], sizes = [8, 32], strides = [1, 1]} : vector<8x128xf32> to vector<8x32xf32>
    %138 = vector.extract_strided_slice %133 {offsets = [0, 96], sizes = [8, 32], strides = [1, 1]} : vector<8x128xf32> to vector<8x32xf32>
    %139 = arith.mulf %136, %123 : vector<8x32xf32>
    %140 = arith.mulf %135, %137 : vector<8x32xf32>
    %141 = arith.addf %139, %140 : vector<8x32xf32>
    %142 = math.tanh %141 : vector<8x32xf32>
    %143 = arith.mulf %138, %142 : vector<8x32xf32>
    %144 = vector.extract_strided_slice %8 {offsets = [56, 0], sizes = [8, 128], strides = [1, 1]} : vector<64x128xf32> to vector<8x128xf32>
    %cst_29 = arith.constant dense<0.000000e+00> : vector<8x128xf32>
    %145 = tpu.matmul %143, %13, %cst_29 {dimension_numbers = #tpu.dot_dimension_numbers<[1], [0], [0], [1], [0, 0, 1, 1], [], []>} : vector<8x32xf32>, vector<32x128xf32>, vector<8x128xf32> -> vector<8x128xf32>
    %146 = arith.addf %144, %145 : vector<8x128xf32>
    %147 = arith.negf %146 : vector<8x128xf32>
    %148 = math.exp %147 : vector<8x128xf32>
    %cst_30 = arith.constant 1.000000e+00 : f32
    %149 = vector.broadcast %cst_30 : f32 to vector<8x128xf32>
    %150 = arith.addf %149, %148 : vector<8x128xf32>
    %151 = arith.divf %149, %150 : vector<8x128xf32>
    %152 = math.tanh %146 : vector<8x128xf32>
    %153 = vector.extract_strided_slice %151 {offsets = [0, 0], sizes = [8, 32], strides = [1, 1]} : vector<8x128xf32> to vector<8x32xf32>
    %154 = vector.extract_strided_slice %151 {offsets = [0, 32], sizes = [8, 32], strides = [1, 1]} : vector<8x128xf32> to vector<8x32xf32>
    %155 = vector.extract_strided_slice %152 {offsets = [0, 64], sizes = [8, 32], strides = [1, 1]} : vector<8x128xf32> to vector<8x32xf32>
    %156 = vector.extract_strided_slice %151 {offsets = [0, 96], sizes = [8, 32], strides = [1, 1]} : vector<8x128xf32> to vector<8x32xf32>
    %157 = arith.mulf %154, %141 : vector<8x32xf32>
    %158 = arith.mulf %153, %155 : vector<8x32xf32>
    %159 = arith.addf %157, %158 : vector<8x32xf32>
    %160 = math.tanh %159 : vector<8x32xf32>
    %161 = arith.mulf %156, %160 : vector<8x32xf32>
    %cst_31 = arith.constant 0.000000e+00 : f32
    %162 = vector.broadcast %cst_31 : f32 to vector<8x32xf32>
    %cst_32 = arith.constant 0.000000e+00 : f32
    %163 = vector.broadcast %cst_32 : f32 to vector<8x32xf32>
    %164 = vector.extract_strided_slice %11 {offsets = [56, 0], sizes = [8, 128], strides = [1, 1]} : vector<64x128xf32> to vector<8x128xf32>
    %cst_33 = arith.constant dense<0.000000e+00> : vector<8x128xf32>
    %165 = tpu.matmul %162, %15, %cst_33 {dimension_numbers = #tpu.dot_dimension_numbers<[1], [0], [0], [1], [0, 0, 1, 1], [], []>} : vector<8x32xf32>, vector<32x128xf32>, vector<8x128xf32> -> vector<8x128xf32>
    %166 = arith.addf %164, %165 : vector<8x128xf32>
    %167 = arith.negf %166 : vector<8x128xf32>
    %168 = math.exp %167 : vector<8x128xf32>
    %cst_34 = arith.constant 1.000000e+00 : f32
    %169 = vector.broadcast %cst_34 : f32 to vector<8x128xf32>
    %170 = arith.addf %169, %168 : vector<8x128xf32>
    %171 = arith.divf %169, %170 : vector<8x128xf32>
    %172 = math.tanh %166 : vector<8x128xf32>
    %173 = vector.extract_strided_slice %171 {offsets = [0, 0], sizes = [8, 32], strides = [1, 1]} : vector<8x128xf32> to vector<8x32xf32>
    %174 = vector.extract_strided_slice %171 {offsets = [0, 32], sizes = [8, 32], strides = [1, 1]} : vector<8x128xf32> to vector<8x32xf32>
    %175 = vector.extract_strided_slice %172 {offsets = [0, 64], sizes = [8, 32], strides = [1, 1]} : vector<8x128xf32> to vector<8x32xf32>
    %176 = vector.extract_strided_slice %171 {offsets = [0, 96], sizes = [8, 32], strides = [1, 1]} : vector<8x128xf32> to vector<8x32xf32>
    %177 = arith.mulf %174, %163 : vector<8x32xf32>
    %178 = arith.mulf %173, %175 : vector<8x32xf32>
    %179 = arith.addf %177, %178 : vector<8x32xf32>
    %180 = math.tanh %179 : vector<8x32xf32>
    %181 = arith.mulf %176, %180 : vector<8x32xf32>
    %182 = vector.extract_strided_slice %11 {offsets = [48, 0], sizes = [8, 128], strides = [1, 1]} : vector<64x128xf32> to vector<8x128xf32>
    %cst_35 = arith.constant dense<0.000000e+00> : vector<8x128xf32>
    %183 = tpu.matmul %181, %15, %cst_35 {dimension_numbers = #tpu.dot_dimension_numbers<[1], [0], [0], [1], [0, 0, 1, 1], [], []>} : vector<8x32xf32>, vector<32x128xf32>, vector<8x128xf32> -> vector<8x128xf32>
    %184 = arith.addf %182, %183 : vector<8x128xf32>
    %185 = arith.negf %184 : vector<8x128xf32>
    %186 = math.exp %185 : vector<8x128xf32>
    %cst_36 = arith.constant 1.000000e+00 : f32
    %187 = vector.broadcast %cst_36 : f32 to vector<8x128xf32>
    %188 = arith.addf %187, %186 : vector<8x128xf32>
    %189 = arith.divf %187, %188 : vector<8x128xf32>
    %190 = math.tanh %184 : vector<8x128xf32>
    %191 = vector.extract_strided_slice %189 {offsets = [0, 0], sizes = [8, 32], strides = [1, 1]} : vector<8x128xf32> to vector<8x32xf32>
    %192 = vector.extract_strided_slice %189 {offsets = [0, 32], sizes = [8, 32], strides = [1, 1]} : vector<8x128xf32> to vector<8x32xf32>
    %193 = vector.extract_strided_slice %190 {offsets = [0, 64], sizes = [8, 32], strides = [1, 1]} : vector<8x128xf32> to vector<8x32xf32>
    %194 = vector.extract_strided_slice %189 {offsets = [0, 96], sizes = [8, 32], strides = [1, 1]} : vector<8x128xf32> to vector<8x32xf32>
    %195 = arith.mulf %192, %179 : vector<8x32xf32>
    %196 = arith.mulf %191, %193 : vector<8x32xf32>
    %197 = arith.addf %195, %196 : vector<8x32xf32>
    %198 = math.tanh %197 : vector<8x32xf32>
    %199 = arith.mulf %194, %198 : vector<8x32xf32>
    %200 = vector.extract_strided_slice %11 {offsets = [40, 0], sizes = [8, 128], strides = [1, 1]} : vector<64x128xf32> to vector<8x128xf32>
    %cst_37 = arith.constant dense<0.000000e+00> : vector<8x128xf32>
    %201 = tpu.matmul %199, %15, %cst_37 {dimension_numbers = #tpu.dot_dimension_numbers<[1], [0], [0], [1], [0, 0, 1, 1], [], []>} : vector<8x32xf32>, vector<32x128xf32>, vector<8x128xf32> -> vector<8x128xf32>
    %202 = arith.addf %200, %201 : vector<8x128xf32>
    %203 = arith.negf %202 : vector<8x128xf32>
    %204 = math.exp %203 : vector<8x128xf32>
    %cst_38 = arith.constant 1.000000e+00 : f32
    %205 = vector.broadcast %cst_38 : f32 to vector<8x128xf32>
    %206 = arith.addf %205, %204 : vector<8x128xf32>
    %207 = arith.divf %205, %206 : vector<8x128xf32>
    %208 = math.tanh %202 : vector<8x128xf32>
    %209 = vector.extract_strided_slice %207 {offsets = [0, 0], sizes = [8, 32], strides = [1, 1]} : vector<8x128xf32> to vector<8x32xf32>
    %210 = vector.extract_strided_slice %207 {offsets = [0, 32], sizes = [8, 32], strides = [1, 1]} : vector<8x128xf32> to vector<8x32xf32>
    %211 = vector.extract_strided_slice %208 {offsets = [0, 64], sizes = [8, 32], strides = [1, 1]} : vector<8x128xf32> to vector<8x32xf32>
    %212 = vector.extract_strided_slice %207 {offsets = [0, 96], sizes = [8, 32], strides = [1, 1]} : vector<8x128xf32> to vector<8x32xf32>
    %213 = arith.mulf %210, %197 : vector<8x32xf32>
    %214 = arith.mulf %209, %211 : vector<8x32xf32>
    %215 = arith.addf %213, %214 : vector<8x32xf32>
    %216 = math.tanh %215 : vector<8x32xf32>
    %217 = arith.mulf %212, %216 : vector<8x32xf32>
    %218 = vector.extract_strided_slice %11 {offsets = [32, 0], sizes = [8, 128], strides = [1, 1]} : vector<64x128xf32> to vector<8x128xf32>
    %cst_39 = arith.constant dense<0.000000e+00> : vector<8x128xf32>
    %219 = tpu.matmul %217, %15, %cst_39 {dimension_numbers = #tpu.dot_dimension_numbers<[1], [0], [0], [1], [0, 0, 1, 1], [], []>} : vector<8x32xf32>, vector<32x128xf32>, vector<8x128xf32> -> vector<8x128xf32>
    %220 = arith.addf %218, %219 : vector<8x128xf32>
    %221 = arith.negf %220 : vector<8x128xf32>
    %222 = math.exp %221 : vector<8x128xf32>
    %cst_40 = arith.constant 1.000000e+00 : f32
    %223 = vector.broadcast %cst_40 : f32 to vector<8x128xf32>
    %224 = arith.addf %223, %222 : vector<8x128xf32>
    %225 = arith.divf %223, %224 : vector<8x128xf32>
    %226 = math.tanh %220 : vector<8x128xf32>
    %227 = vector.extract_strided_slice %225 {offsets = [0, 0], sizes = [8, 32], strides = [1, 1]} : vector<8x128xf32> to vector<8x32xf32>
    %228 = vector.extract_strided_slice %225 {offsets = [0, 32], sizes = [8, 32], strides = [1, 1]} : vector<8x128xf32> to vector<8x32xf32>
    %229 = vector.extract_strided_slice %226 {offsets = [0, 64], sizes = [8, 32], strides = [1, 1]} : vector<8x128xf32> to vector<8x32xf32>
    %230 = vector.extract_strided_slice %225 {offsets = [0, 96], sizes = [8, 32], strides = [1, 1]} : vector<8x128xf32> to vector<8x32xf32>
    %231 = arith.mulf %228, %215 : vector<8x32xf32>
    %232 = arith.mulf %227, %229 : vector<8x32xf32>
    %233 = arith.addf %231, %232 : vector<8x32xf32>
    %234 = math.tanh %233 : vector<8x32xf32>
    %235 = arith.mulf %230, %234 : vector<8x32xf32>
    %236 = vector.extract_strided_slice %11 {offsets = [24, 0], sizes = [8, 128], strides = [1, 1]} : vector<64x128xf32> to vector<8x128xf32>
    %cst_41 = arith.constant dense<0.000000e+00> : vector<8x128xf32>
    %237 = tpu.matmul %235, %15, %cst_41 {dimension_numbers = #tpu.dot_dimension_numbers<[1], [0], [0], [1], [0, 0, 1, 1], [], []>} : vector<8x32xf32>, vector<32x128xf32>, vector<8x128xf32> -> vector<8x128xf32>
    %238 = arith.addf %236, %237 : vector<8x128xf32>
    %239 = arith.negf %238 : vector<8x128xf32>
    %240 = math.exp %239 : vector<8x128xf32>
    %cst_42 = arith.constant 1.000000e+00 : f32
    %241 = vector.broadcast %cst_42 : f32 to vector<8x128xf32>
    %242 = arith.addf %241, %240 : vector<8x128xf32>
    %243 = arith.divf %241, %242 : vector<8x128xf32>
    %244 = math.tanh %238 : vector<8x128xf32>
    %245 = vector.extract_strided_slice %243 {offsets = [0, 0], sizes = [8, 32], strides = [1, 1]} : vector<8x128xf32> to vector<8x32xf32>
    %246 = vector.extract_strided_slice %243 {offsets = [0, 32], sizes = [8, 32], strides = [1, 1]} : vector<8x128xf32> to vector<8x32xf32>
    %247 = vector.extract_strided_slice %244 {offsets = [0, 64], sizes = [8, 32], strides = [1, 1]} : vector<8x128xf32> to vector<8x32xf32>
    %248 = vector.extract_strided_slice %243 {offsets = [0, 96], sizes = [8, 32], strides = [1, 1]} : vector<8x128xf32> to vector<8x32xf32>
    %249 = arith.mulf %246, %233 : vector<8x32xf32>
    %250 = arith.mulf %245, %247 : vector<8x32xf32>
    %251 = arith.addf %249, %250 : vector<8x32xf32>
    %252 = math.tanh %251 : vector<8x32xf32>
    %253 = arith.mulf %248, %252 : vector<8x32xf32>
    %254 = vector.extract_strided_slice %11 {offsets = [16, 0], sizes = [8, 128], strides = [1, 1]} : vector<64x128xf32> to vector<8x128xf32>
    %cst_43 = arith.constant dense<0.000000e+00> : vector<8x128xf32>
    %255 = tpu.matmul %253, %15, %cst_43 {dimension_numbers = #tpu.dot_dimension_numbers<[1], [0], [0], [1], [0, 0, 1, 1], [], []>} : vector<8x32xf32>, vector<32x128xf32>, vector<8x128xf32> -> vector<8x128xf32>
    %256 = arith.addf %254, %255 : vector<8x128xf32>
    %257 = arith.negf %256 : vector<8x128xf32>
    %258 = math.exp %257 : vector<8x128xf32>
    %cst_44 = arith.constant 1.000000e+00 : f32
    %259 = vector.broadcast %cst_44 : f32 to vector<8x128xf32>
    %260 = arith.addf %259, %258 : vector<8x128xf32>
    %261 = arith.divf %259, %260 : vector<8x128xf32>
    %262 = math.tanh %256 : vector<8x128xf32>
    %263 = vector.extract_strided_slice %261 {offsets = [0, 0], sizes = [8, 32], strides = [1, 1]} : vector<8x128xf32> to vector<8x32xf32>
    %264 = vector.extract_strided_slice %261 {offsets = [0, 32], sizes = [8, 32], strides = [1, 1]} : vector<8x128xf32> to vector<8x32xf32>
    %265 = vector.extract_strided_slice %262 {offsets = [0, 64], sizes = [8, 32], strides = [1, 1]} : vector<8x128xf32> to vector<8x32xf32>
    %266 = vector.extract_strided_slice %261 {offsets = [0, 96], sizes = [8, 32], strides = [1, 1]} : vector<8x128xf32> to vector<8x32xf32>
    %267 = arith.mulf %264, %251 : vector<8x32xf32>
    %268 = arith.mulf %263, %265 : vector<8x32xf32>
    %269 = arith.addf %267, %268 : vector<8x32xf32>
    %270 = math.tanh %269 : vector<8x32xf32>
    %271 = arith.mulf %266, %270 : vector<8x32xf32>
    %272 = vector.extract_strided_slice %11 {offsets = [8, 0], sizes = [8, 128], strides = [1, 1]} : vector<64x128xf32> to vector<8x128xf32>
    %cst_45 = arith.constant dense<0.000000e+00> : vector<8x128xf32>
    %273 = tpu.matmul %271, %15, %cst_45 {dimension_numbers = #tpu.dot_dimension_numbers<[1], [0], [0], [1], [0, 0, 1, 1], [], []>} : vector<8x32xf32>, vector<32x128xf32>, vector<8x128xf32> -> vector<8x128xf32>
    %274 = arith.addf %272, %273 : vector<8x128xf32>
    %275 = arith.negf %274 : vector<8x128xf32>
    %276 = math.exp %275 : vector<8x128xf32>
    %cst_46 = arith.constant 1.000000e+00 : f32
    %277 = vector.broadcast %cst_46 : f32 to vector<8x128xf32>
    %278 = arith.addf %277, %276 : vector<8x128xf32>
    %279 = arith.divf %277, %278 : vector<8x128xf32>
    %280 = math.tanh %274 : vector<8x128xf32>
    %281 = vector.extract_strided_slice %279 {offsets = [0, 0], sizes = [8, 32], strides = [1, 1]} : vector<8x128xf32> to vector<8x32xf32>
    %282 = vector.extract_strided_slice %279 {offsets = [0, 32], sizes = [8, 32], strides = [1, 1]} : vector<8x128xf32> to vector<8x32xf32>
    %283 = vector.extract_strided_slice %280 {offsets = [0, 64], sizes = [8, 32], strides = [1, 1]} : vector<8x128xf32> to vector<8x32xf32>
    %284 = vector.extract_strided_slice %279 {offsets = [0, 96], sizes = [8, 32], strides = [1, 1]} : vector<8x128xf32> to vector<8x32xf32>
    %285 = arith.mulf %282, %269 : vector<8x32xf32>
    %286 = arith.mulf %281, %283 : vector<8x32xf32>
    %287 = arith.addf %285, %286 : vector<8x32xf32>
    %288 = math.tanh %287 : vector<8x32xf32>
    %289 = arith.mulf %284, %288 : vector<8x32xf32>
    %290 = vector.extract_strided_slice %11 {offsets = [0, 0], sizes = [8, 128], strides = [1, 1]} : vector<64x128xf32> to vector<8x128xf32>
    %cst_47 = arith.constant dense<0.000000e+00> : vector<8x128xf32>
    %291 = tpu.matmul %289, %15, %cst_47 {dimension_numbers = #tpu.dot_dimension_numbers<[1], [0], [0], [1], [0, 0, 1, 1], [], []>} : vector<8x32xf32>, vector<32x128xf32>, vector<8x128xf32> -> vector<8x128xf32>
    %292 = arith.addf %290, %291 : vector<8x128xf32>
    %293 = arith.negf %292 : vector<8x128xf32>
    %294 = math.exp %293 : vector<8x128xf32>
    %cst_48 = arith.constant 1.000000e+00 : f32
    %295 = vector.broadcast %cst_48 : f32 to vector<8x128xf32>
    %296 = arith.addf %295, %294 : vector<8x128xf32>
    %297 = arith.divf %295, %296 : vector<8x128xf32>
    %298 = math.tanh %292 : vector<8x128xf32>
    %299 = vector.extract_strided_slice %297 {offsets = [0, 0], sizes = [8, 32], strides = [1, 1]} : vector<8x128xf32> to vector<8x32xf32>
    %300 = vector.extract_strided_slice %297 {offsets = [0, 32], sizes = [8, 32], strides = [1, 1]} : vector<8x128xf32> to vector<8x32xf32>
    %301 = vector.extract_strided_slice %298 {offsets = [0, 64], sizes = [8, 32], strides = [1, 1]} : vector<8x128xf32> to vector<8x32xf32>
    %302 = vector.extract_strided_slice %297 {offsets = [0, 96], sizes = [8, 32], strides = [1, 1]} : vector<8x128xf32> to vector<8x32xf32>
    %303 = arith.mulf %300, %287 : vector<8x32xf32>
    %304 = arith.mulf %299, %301 : vector<8x32xf32>
    %305 = arith.addf %303, %304 : vector<8x32xf32>
    %306 = math.tanh %305 : vector<8x32xf32>
    %307 = arith.mulf %302, %306 : vector<8x32xf32>
    %308 = tpu.concatenate %35, %53, %71, %89, %107, %125, %143, %161 in 0 : vector<8x32xf32>, vector<8x32xf32>, vector<8x32xf32>, vector<8x32xf32>, vector<8x32xf32>, vector<8x32xf32>, vector<8x32xf32>, vector<8x32xf32> -> vector<64x32xf32>
    %309 = tpu.concatenate %307, %289, %271, %253, %235, %217, %199, %181 in 0 : vector<8x32xf32>, vector<8x32xf32>, vector<8x32xf32>, vector<8x32xf32>, vector<8x32xf32>, vector<8x32xf32>, vector<8x32xf32>, vector<8x32xf32> -> vector<64x32xf32>
    %310 = tpu.concatenate %308, %309 in 1 : vector<64x32xf32>, vector<64x32xf32> -> vector<64x64xf32>
    %c0_49 = arith.constant 0 : index
    %c0_50 = arith.constant 0 : index
    %311 = vector.load %arg5[%c0_49, %c0_50] : memref<64x64xf32, #tpu.memory_space<vmem>>, vector<64x64xf32>
    tpu.vector_store %arg5[%c0_49, %c0_50], %310 {strides = array<i32>} : memref<64x64xf32, #tpu.memory_space<vmem>>, vector<64x64xf32>,
    %312 = tpu.concatenate %161, %307, %159, %305 in 1 : vector<8x32xf32>, vector<8x32xf32>, vector<8x32xf32>, vector<8x32xf32> -> vector<8x128xf32>
    %c0_51 = arith.constant 0 : index
    %c0_52 = arith.constant 0 : index
    %313 = vector.load %arg3[%c0_51, %c0_52] : memref<128x64xf32, #tpu.memory_space<vmem>>, vector<128x64xf32>
    %cst_53 = arith.constant dense<0.000000e+00> : vector<8x64xf32>
    %314 = tpu.matmul %312, %313, %cst_53 {dimension_numbers = #tpu.dot_dimension_numbers<[1], [0], [0], [1], [0, 0, 1, 1], [], []>} : vector<8x128xf32>, vector<128x64xf32>, vector<8x64xf32> -> vector<8x64xf32>
    %c0_54 = arith.constant 0 : index
    %c0_55 = arith.constant 0 : index
    %315 = vector.load %arg4[%c0_54, %c0_55] : memref<1x64xf32, #tpu.memory_space<vmem>>, vector<1x64xf32>
    %316 = vector.broadcast %315 : vector<1x64xf32> to vector<8x64xf32>
    %317 = arith.addf %314, %316 : vector<8x64xf32>
    %c0_56 = arith.constant 0 : index
    %c0_57 = arith.constant 0 : index
    %318 = vector.load %arg6[%c0_56, %c0_57] : memref<8x64xf32, #tpu.memory_space<vmem>>, vector<8x64xf32>
    tpu.vector_store %arg6[%c0_56, %c0_57], %317 {strides = array<i32>} : memref<8x64xf32, #tpu.memory_space<vmem>>, vector<8x64xf32>,
    return
  }
}

</mosaic_0001>

<bundles_post_ra>
// kernel: encoder_forward.1
= control target key start
LH: loop header
LB: loop body
LE: loop exit
PB: predicated region body
PF: predicated region fallthrough
CT: control target
= control target key end

     0   :  { %v2784_v0 = vmov 0   ;;  %v2785_v2 = vmov 0.0|0.0   ;;  %vm2786_vm0 = vmmov 0   ;;  %v2787_v14 = vmov 0.0   ;;  %s2788_s15 = smov 64   ;;  %s2789_s16 = smov 32   ;;  %s3350_s0 = inlined_call_operand.vmem [shape: s32[64,1], index: 0, kind: input, shape index: {}]   ;;  %s3351_s2 = inlined_call_operand.vmem [shape: f32[2,32,128], index: 2, kind: input, shape index: {}]   ;;  %s3352_s1 = inlined_call_operand.vmem [shape: f32[2,24,128], index: 1, kind: input, shape index: {}]   ;;  %s3353_s5 = inlined_call_operand.vmem [shape: f32[64,64], index: 5, kind: output, shape index: {0}]   ;;  %s3354_s3 = inlined_call_operand.vmem [shape: f32[128,64], index: 3, kind: input, shape index: {}]   ;;  %s3355_s4 = inlined_call_operand.vmem [shape: f32[1,64], index: 4, kind: input, shape index: {}]   ;;  %s3356_s6 = inlined_call_operand.vmem [shape: f32[8,64], index: 6, kind: output, shape index: {1}]  }
   0x1   :  { %2654 = vset.pattern.permute.xlu0 %v2784_v0  ;;  %v22_v1 = vld [vmem:[%s3350_s0] sm:$0xff]  ;;  %2528 = vmatprep.subr.bf16.mxu0 %v2785_v2  ;;  %v323_v4 = vld [vmem:[%s3351_s2 + $0x8] sm:$0xff]  ;;  %v324_v10 = vld [vmem:[%s3351_s2 + $0x10] sm:$0xff]  ;;  %v30_v15 = vlaneseq  ;;  %vm83_vm1 = vcmask 195584   ;;  %vm331_vm10 = vcmask 261120   ;;  %vm1969_vm11 = vcmask 523264  }
   0x2   :  { %v322_v3 = vld [vmem:[%s3351_s2] sm:$0xff]  ;;  %33 = vperm.xlu0 %2654, %v22_v1   ;;  %v81_v6 = vld [vmem:[%s3352_s1 + $0x8] sm:$0xff]  ;;  %2655 = vset.pattern.permute.xlu1 %v2784_v0  ;;  %v325_v11 = vld [vmem:[%s3351_s2 + $0x18] sm:$0xff]  ;;  %vm1988_vm12 = vcmask 785408  }
   0x3   :  { %v80_v5 = vld [vmem:[%s3352_s1] sm:$0xff]  ;;  %v23_v7 = vld [vmem:[%s3350_s0 + $0x8] sm:$0xff]  ;;  %v2844_v8 = vpack.c.bf16 %v323_v4, %v322_v3  ;;  %v2853_v12 = vpack.c.bf16 %v325_v11, %v324_v10  ;;  %v82_v13 = vld [vmem:[%s3352_s1 + $0x10] sm:$0xff]  ;;  %2317 = vmatprep.mubr.msk.f32.mxu0 %vm2786_vm0, %v2787_v14  ;;  %v2870_v16 = vand.u32 127, %v30_v15 }
   0x4   :  { %v2520_v9 = vpack.c.bf16 %v81_v6, %v80_v5  ;;  %v24_v33 = vld [vmem:[%s3350_s0 + $0x10] sm:$0xff]  ;;  %v26_v34 = vld [vmem:[%s3350_s0 + $0x20] sm:$0xff]  ;;  %v25_v40 = vld [vmem:[%s3350_s0 + $0x18] sm:$0xff] }
   0x5   :  { %2530 = vmatpush3.bf16.msra.mxu0 %v2844_v8  ;;  %v28_v35 = vld [vmem:[%s3350_s0 + $0x30] sm:$0xff]  ;;  %v27_v42 = vld [vmem:[%s3350_s0 + $0x28] sm:$0xff]  ;;  %v29_v44 = vld [vmem:[%s3350_s0 + $0x38] sm:$0xff] }
   0x6   :  { %2521 = vmatprep.subr.bf16.mxu1 %v2520_v9  ;;  %36 = vperm.xlu0 %2654, %v23_v7   ;;  %v2108_v45 = vld [vmem:[%s3352_s1 + $0x18] sm:$0xff]  ;;  %v2109_v46 = vld [vmem:[%s3352_s1 + $0x20] sm:$0xff]  ;;  %v2110_v48 = vld [vmem:[%s3352_s1 + $0x28] sm:$0xff] }
   0x7   :  { %2523 = vmatpush3.bf16.msra.mxu1 %v2520_v9  ;;  %2531 = vmatprep.subr.bf16.mxu0 %v2785_v2  ;;  %v2524_v47 = vpack.c.bf16 %v2109_v46, %v2108_v45 }
   0x8   :  { %2277 = vmatprep.subr.mxu1 %v82_v13 }
   0x9   :  { %2533 = vmatpush3.bf16.msra.mxu0 %v2853_v12 }
   0xa   :  { %2540 = vmatprep.subr.bf16.mxu0 %v2785_v2 }
   0xb   :  { %2278 = vmatpush3.msra.mxu1 %v82_v13 }
   0xc   :  { %2318 = vmatmul.mubr.f32.vlgmr.msra.gmra.mrb[0].mxu0 %v2787_v14  ;;  %2525 = vmatprep.subr.bf16.mxu1 %v2524_v47 }
   0xd   :  { %2542 = vmatpush3.bf16.msra.mxu0 %v2844_v8  ;;  %2339 = vmatprep.mubr.msk.f32.mxu0 %vm2786_vm0, %v2787_v14 }
   0xe   :  { %2543 = vmatprep.subr.bf16.mxu0 %v2785_v2 }
  0x11   :  { %2545 = vmatpush3.bf16.msra.mxu0 %v2853_v12 }
  0x12   :  { %2552 = vmatprep.subr.bf16.mxu0 %v2785_v2 }
  0x81   :  { %v34_v17 = vpop.permute.xlu0 %33 }
  0x82   :  { %vm56_vm2 = vcmp.eq.s32.totalorder %v2870_v16, %v34_v17 }
  0x83   :  { %v2874_v18 = vsel %vm56_vm2, 1.0, %v2787_v14 }
  0x84   :  { %2279 = vmatprep.mubr.msk.f32.mxu1 %vm83_vm1, %v2874_v18 }
  0x85   :  { %v37_v19 = vpop.permute.xlu0 %36 }
  0x86   :  { %vm57_vm3 = vcmp.eq.s32.totalorder %v2870_v16, %v37_v19 }
  0x87   :  { %v2880_v20 = vsel %vm57_vm3, 1.0, %v2787_v14 }
  0x88   :  { %2280 = vmatmul.mubr.msk.f32.vlgmr.msra.gmra.mrb[0].mxu1 %vm83_vm1, %v2880_v20 }
  0x89   :  { %2527 = vmatpush3.bf16.msra.mxu1 %v2524_v47 }
  0x8a   :  { %2295 = vmatprep.subr.mxu1 %v2110_v48 }
  0x8d   :  { %2296 = vmatpush3.msra.mxu1 %v2110_v48 }
  0x8e   :  { %2534 = vmatprep.subr.bf16.mxu1 %v2785_v2 }
  0xdf   :  { %v401_v21 = vpop.f32.mrb[0].mxu0 }
  0xe0   :  { %v2319_v22 = vpop.f32.mrb[1].mxu0 }
 0x15b   :  { %v2884_v23 = vpop.f32.mrb[0].mxu1 }
 0x15c   :  { %v174_v24 = vpop.f32.mrb[1].mxu1 }
 0x15d   :  { %v405_v25 = vadd.f32 %v401_v21, %v174_v24 }
 0x15f   :  { %2656 = vtanh.f32 %v405_v25  ;;  %v2123_v27 = vmul.f32 -1.442695, %v405_v25 }
 0x161   :  { %2658 = vpow2.f32 %v2123_v27 }
 0x169   :  { %v2657_v26 = vpop.eup %2656 }
 0x16a   :  { %415 = vrot.lane.b32.xlu1 %v2657_v26, %s2788_s15 }
 0x16b   :  { %v2659_v28 = vpop.eup %2658 }
 0x16c   :  { %v409_v29 = vadd.f32 1.0, %v2659_v28 }
 0x16e   :  { %2660 = vrcp.f32 %v409_v29 }
 0x178   :  { %v2661_v30 = vpop.eup %2660 }
 0x179   :  { %v413_v36 = vmul.f32 0.0, %v2661_v30 }
 0x1dc   :  { %v416_v31 = vpop.permute.xlu1 %415 }
 0x1dd   :  { %v418_v32 = vmul.f32 %v2661_v30, %v416_v31 }
 0x1df   :  { %420 = vrot.lane.b32.xlu1 %v418_v32, %s2789_s16 }
 0x1e3   :  { %39 = vperm.xlu1 %2655, %v24_v33  }
 0x1e7   :  { %45 = vperm.xlu1 %2655, %v26_v34  }
 0x1eb   :  { %51 = vperm.xlu1 %2655, %v28_v35  }
 0x251   :  { %v421_v37 = vpop.permute.xlu1 %420 }
 0x252   :  { %v2897_v38 = vadd.f32 %v421_v37, %v413_v36 }
 0x254   :  { %2662 = vtanh.f32 %v2897_v38 }
 0x25e   :  { %v2663_v39 = vpop.eup %2662 }
 0x25f   :  { %426 = vrot.lane.b32.xlu0 %v2663_v39, %s2788_s15 }
 0x262   :  { %v40_v41 = vpop.permute.xlu1 %39 }
 0x263   :  { %42 = vperm.xlu0 %2654, %v25_v40   ;;  %vm58_vm4 = vcmp.eq.s32.totalorder %v2870_v16, %v40_v41 }
 0x264   :  { %v2094_v43 = vsel %vm58_vm4, 1.0, %v2787_v14 }
 0x265   :  { %2282 = vmatprep.mubr.msk.f32.mxu1 %vm83_vm1, %v2094_v43 }
 0x266   :  { %v46_v51 = vpop.permute.xlu1 %45 }
 0x267   :  { %48 = vperm.xlu0 %2654, %v27_v42   ;;  %vm60_vm5 = vcmp.eq.s32.totalorder %v2870_v16, %v46_v51 }
 0x268   :  { %v2096_v54 = vsel %vm60_vm5, 1.0, %v2787_v14 }
 0x26a   :  { %v52_v52 = vpop.permute.xlu1 %51 }
 0x26b   :  { %54 = vperm.xlu0 %2654, %v29_v44   ;;  %vm62_vm7 = vcmp.eq.s32.totalorder %v2870_v16, %v52_v52 }
 0x26c   :  { %v2098_v57 = vsel %vm62_vm7, 1.0, %v2787_v14 }
 0x2d1   :  { %v427_v49 = vpop.permute.xlu0 %426 }
 0x2d2   :  { %v429_v50 = vmul.f32 %v2661_v30, %v427_v49 }
 0x2d4   :  { %431 = vrot.lane.b32.xlu1 %v429_v50, %s2789_s16 }
 0x2e2   :  { %v43_v53 = vpop.permute.xlu0 %42 }
 0x2e3   :  { %vm59_vm6 = vcmp.eq.s32.totalorder %v2870_v16, %v43_v53 }
 0x2e4   :  { %v2095_v55 = vsel %vm59_vm6, 1.0, %v2787_v14 }
 0x2e5   :  { %2283 = vmatmul.mubr.msk.f32.gmra.mrb[2].mxu1 %vm83_vm1, %v2095_v55 }
 0x2e6   :  { %v49_v56 = vpop.permute.xlu0 %48  ;;  %2285 = vmatprep.mubr.msk.f32.mxu1 %vm83_vm1, %v2096_v54 }
 0x2e7   :  { %vm61_vm8 = vcmp.eq.s32.totalorder %v2870_v16, %v49_v56 }
 0x2e8   :  { %v2097_v58 = vsel %vm61_vm8, 1.0, %v2787_v14 }
 0x2e9   :  { %2286 = vmatmul.mubr.msk.f32.gmra.mrb[4].mxu1 %vm83_vm1, %v2097_v58 }
 0x2ea   :  { %v55_v59 = vpop.permute.xlu0 %54  ;;  %2288 = vmatprep.mubr.msk.f32.mxu1 %vm83_vm1, %v2098_v57 }
 0x2eb   :  { %vm63_vm9 = vcmp.eq.s32.totalorder %v2870_v16, %v55_v59 }
 0x2ec   :  { %v2099_v60 = vsel %vm63_vm9, 1.0, %v2787_v14 }
 0x2ed   :  { %2289 = vmatmul.mubr.msk.f32.gmra.mrb[6].mxu1 %vm83_vm1, %v2099_v60 }
 0x2ee   :  { %2297 = vmatprep.mubr.msk.f32.mxu1 %vm83_vm1, %v2874_v18 }
 0x2f1   :  { %2298 = vmatmul.mubr.msk.f32.vlgmr.msra.gmra.mrb[8].mxu1 %vm83_vm1, %v2880_v20 }
 0x2f2   :  { %2300 = vmatprep.mubr.msk.f32.mxu1 %vm83_vm1, %v2094_v43  ;;  %2536 = vmatpush3.bf16.msra.mxu1 %v2844_v8 }
 0x2f3   :  { %2537 = vmatprep.subr.bf16.mxu1 %v2785_v2 }
 0x2f5   :  { %2301 = vmatmul.mubr.msk.f32.gmra.mrb[10].mxu1 %vm83_vm1, %v2095_v55 }
 0x2f6   :  { %2303 = vmatprep.mubr.msk.f32.mxu1 %vm83_vm1, %v2096_v54  ;;  %2539 = vmatpush3.bf16.msra.mxu1 %v2853_v12 }
 0x2f7   :  { %2546 = vmatprep.subr.bf16.mxu1 %v2785_v2 }
 0x2f9   :  { %2304 = vmatmul.mubr.msk.f32.gmra.mrb[12].mxu1 %vm83_vm1, %v2097_v58 }
 0x2fa   :  { %2306 = vmatprep.mubr.msk.f32.mxu1 %vm83_vm1, %v2098_v57 }
 0x2fd   :  { %2307 = vmatmul.mubr.msk.f32.gmra.mrb[14].mxu1 %vm83_vm1, %v2099_v60 }
 0x2fe   :  { %2328 = vmatprep.mubr.msk.f32.mxu1 %vm2786_vm0, %v2787_v14 }
 0x346   :  { %v2955_v61 = vpop.permute.xlu1 %431 }
 0x347   :  { %2329 = vmatmul.mubr.msk.f32.vlgmr.msra.gmra.mrb[16].mxu1 %vm331_vm10, %v2955_v61 }
 0x348   :  { %2548 = vmatpush3.bf16.msra.mxu1 %v2844_v8  ;;  %2350 = vmatprep.mubr.msk.f32.mxu1 %vm2786_vm0, %v2787_v14 }
 0x349   :  { %2549 = vmatprep.subr.bf16.mxu1 %v2785_v2 }
 0x34c   :  { %2551 = vmatpush3.bf16.msra.mxu1 %v2853_v12 }
 0x34d   :  { %2558 = vmatprep.subr.bf16.mxu1 %v2785_v2 }
 0x3b8   :  { %v2965_v62 = vpop.f32.mrb[2].mxu1 }
 0x3b9   :  { %v184_v63 = vpop.f32.mrb[3].mxu1 }
 0x3bc   :  { %v2967_v0 = vpop.f32.mrb[4].mxu1 }
 0x3bd   :  { %v2969_v1 = vpop.f32.mrb[5].mxu1 }
 0x3c0   :  { %v2971_v3 = vpop.f32.mrb[6].mxu1 }
 0x3c1   :  { %v2973_v4 = vpop.f32.mrb[7].mxu1 }
 0x3c4   :  { %v2975_v5 = vpop.f32.mrb[8].mxu1 }
 0x3c5   :  { %v2977_v6 = vpop.f32.mrb[9].mxu1 }
 0x3c8   :  { %v2979_v7 = vpop.f32.mrb[10].mxu1 }
 0x3c9   :  { %v2981_v9 = vpop.f32.mrb[11].mxu1 }
 0x3cc   :  { %v2983_v10 = vpop.f32.mrb[12].mxu1 }
 0x3cd   :  { %v2985_v11 = vpop.f32.mrb[13].mxu1 }
 0x3d0   :  { %v2987_v13 = vpop.f32.mrb[14].mxu1 }
 0x3d1   :  { %v2989_v15 = vpop.f32.mrb[15].mxu1 }
 0x41a   :  { %v501_v16 = vpop.f32.mrb[16].mxu1 }
 0x41b   :  { %v505_v17 = vadd.f32 %v2884_v23, %v501_v16  ;;  %v2330_v18 = vpop.f32.mrb[17].mxu1 }
 0x41d   :  { %2664 = vtanh.f32 %v505_v17  ;;  %v2125_v20 = vmul.f32 -1.442695, %v505_v17 }
 0x41f   :  { %2666 = vpow2.f32 %v2125_v20 }
 0x427   :  { %v2665_v19 = vpop.eup %2664 }
 0x428   :  { %515 = vrot.lane.b32.xlu0 %v2665_v19, %s2788_s15 }
 0x429   :  { %v2667_v21 = vpop.eup %2666 }
 0x42a   :  { %v509_v22 = vadd.f32 1.0, %v2667_v21 }
 0x42c   :  { %2668 = vrcp.f32 %v509_v22 }
 0x436   :  { %v2669_v24 = vpop.eup %2668 }
 0x437   :  { %v513_v27 = vmul.f32 %v2669_v24, %v2897_v38 }
 0x49a   :  { %v516_v25 = vpop.permute.xlu0 %515 }
 0x49b   :  { %v518_v26 = vmul.f32 %v2669_v24, %v516_v25 }
 0x49d   :  { %520 = vrot.lane.b32.xlu1 %v518_v26, %s2789_s16 }
 0x50f   :  { %v521_v28 = vpop.permute.xlu1 %520 }
 0x510   :  { %v523_v29 = vadd.f32 %v521_v28, %v513_v27 }
 0x512   :  { %2670 = vtanh.f32 %v523_v29 }
 0x51c   :  { %v2671_v23 = vpop.eup %2670 }
 0x51d   :  { %526 = vrot.lane.b32.xlu0 %v2671_v23, %s2788_s15 }
 0x58f   :  { %v527_v30 = vpop.permute.xlu0 %526 }
 0x590   :  { %v529_v31 = vmul.f32 %v2669_v24, %v527_v30 }
 0x592   :  { %531 = vrot.lane.b32.xlu1 %v529_v31, %s2789_s16 }
 0x604   :  { %v2997_v32 = vpop.permute.xlu1 %531 }
 0x605   :  { %2340 = vmatmul.mubr.msk.f32.vlgmr.msra.gmra.mrb[2].mxu0 %vm331_vm10, %v2997_v32 }
 0x606   :  { %2554 = vmatpush3.bf16.msra.mxu0 %v2844_v8  ;;  %2361 = vmatprep.mubr.msk.f32.mxu0 %vm2786_vm0, %v2787_v14 }
 0x607   :  { %2555 = vmatprep.subr.bf16.mxu0 %v2785_v2 }
 0x60a   :  { %2557 = vmatpush3.bf16.msra.mxu0 %v2853_v12 }
 0x60b   :  { %2564 = vmatprep.subr.bf16.mxu0 %v2785_v2 }
 0x6d8   :  { %v601_v33 = vpop.f32.mrb[2].mxu0 }
 0x6d9   :  { %v605_v34 = vadd.f32 %v601_v33, %v184_v63  ;;  %v2341_v35 = vpop.f32.mrb[3].mxu0 }
 0x6db   :  { %2672 = vtanh.f32 %v605_v34  ;;  %v2127_v37 = vmul.f32 -1.442695, %v605_v34 }
 0x6dd   :  { %2674 = vpow2.f32 %v2127_v37 }
 0x6e5   :  { %v2673_v36 = vpop.eup %2672 }
 0x6e6   :  { %615 = vrot.lane.b32.xlu0 %v2673_v36, %s2788_s15 }
 0x6e7   :  { %v2675_v38 = vpop.eup %2674 }
 0x6e8   :  { %v609_v39 = vadd.f32 1.0, %v2675_v38 }
 0x6ea   :  { %2676 = vrcp.f32 %v609_v39 }
 0x6f4   :  { %v2677_v40 = vpop.eup %2676 }
 0x6f5   :  { %v613_v43 = vmul.f32 %v2677_v40, %v523_v29 }
 0x758   :  { %v616_v41 = vpop.permute.xlu0 %615 }
 0x759   :  { %v618_v42 = vmul.f32 %v2677_v40, %v616_v41 }
 0x75b   :  { %620 = vrot.lane.b32.xlu1 %v618_v42, %s2789_s16 }
 0x7cd   :  { %v621_v44 = vpop.permute.xlu1 %620 }
 0x7ce   :  { %v623_v45 = vadd.f32 %v621_v44, %v613_v43 }
 0x7d0   :  { %2678 = vtanh.f32 %v623_v45 }
 0x7da   :  { %v2679_v46 = vpop.eup %2678 }
 0x7db   :  { %626 = vrot.lane.b32.xlu0 %v2679_v46, %s2788_s15 }
 0x84d   :  { %v627_v47 = vpop.permute.xlu0 %626 }
 0x84e   :  { %v629_v48 = vmul.f32 %v2677_v40, %v627_v47 }
 0x850   :  { %631 = vrot.lane.b32.xlu1 %v629_v48, %s2789_s16 }
 0x8c2   :  { %v3011_v49 = vpop.permute.xlu1 %631 }
 0x8c3   :  { %2351 = vmatmul.mubr.msk.f32.vlgmr.msra.gmra.mrb[18].mxu1 %vm331_vm10, %v3011_v49 }
 0x8c4   :  { %2560 = vmatpush3.bf16.msra.mxu1 %v2844_v8  ;;  %2372 = vmatprep.mubr.msk.f32.mxu1 %vm2786_vm0, %v2787_v14 }
 0x8c5   :  { %2561 = vmatprep.subr.bf16.mxu1 %v2785_v2 }
 0x8c8   :  { %2563 = vmatpush3.bf16.msra.mxu1 %v2853_v12 }
 0x8c9   :  { %2570 = vmatprep.subr.bf16.mxu1 %v2785_v2 }
 0x996   :  { %v701_v50 = vpop.f32.mrb[18].mxu1 }
 0x997   :  { %v705_v51 = vadd.f32 %v2965_v62, %v701_v50  ;;  %v2352_v52 = vpop.f32.mrb[19].mxu1 }
 0x998   :  { %v2120_v52 = vld [vmem:[%s3351_s2 + $0x28] sm:$0xff] }
 0x999   :  { %2680 = vtanh.f32 %v705_v51  ;;  %v2129_v54 = vmul.f32 -1.442695, %v705_v51  ;;  %v2119_v51 = vld [vmem:[%s3351_s2 + $0x20] sm:$0xff] }
 0x99b   :  { %2682 = vpow2.f32 %v2129_v54  ;;  %v2121_v54 = vld [vmem:[%s3351_s2 + $0x30] sm:$0xff] }
 0x9a3   :  { %v2681_v53 = vpop.eup %2680 }
 0x9a4   :  { %715 = vrot.lane.b32.xlu0 %v2681_v53, %s2788_s15  ;;  %v3062_v53 = vpack.c.bf16 %v2120_v52, %v2119_v51 }
 0x9a5   :  { %v2683_v55 = vpop.eup %2682 }
 0x9a6   :  { %v709_v56 = vadd.f32 1.0, %v2683_v55  ;;  %v2122_v55 = vld [vmem:[%s3351_s2 + $0x38] sm:$0xff] }
 0x9a8   :  { %2684 = vrcp.f32 %v709_v56 }
 0x9b2   :  { %v2685_v57 = vpop.eup %2684 }
 0x9b3   :  { %v713_v60 = vmul.f32 %v2685_v57, %v623_v45 }
 0xa16   :  { %v716_v58 = vpop.permute.xlu0 %715 }
 0xa17   :  { %v718_v59 = vmul.f32 %v2685_v57, %v716_v58 }
 0xa19   :  { %720 = vrot.lane.b32.xlu1 %v718_v59, %s2789_s16 }
 0xa8b   :  { %v721_v63 = vpop.permute.xlu1 %720 }
 0xa8c   :  { %v723_v16 = vadd.f32 %v721_v63, %v713_v60 }
 0xa8e   :  { %2686 = vtanh.f32 %v723_v16 }
 0xa98   :  { %v2687_v62 = vpop.eup %2686 }
 0xa99   :  { %726 = vrot.lane.b32.xlu0 %v2687_v62, %s2788_s15 }
 0xb0b   :  { %v727_v17 = vpop.permute.xlu0 %726 }
 0xb0c   :  { %v729_v18 = vmul.f32 %v2685_v57, %v727_v17  ;;  %v3075_v57 = vpack.c.bf16 %v2122_v55, %v2121_v54 }
 0xb0e   :  { %731 = vrot.lane.b32.xlu1 %v729_v18, %s2789_s16 }
 0xb80   :  { %v3026_v19 = vpop.permute.xlu1 %731 }
 0xb81   :  { %2362 = vmatmul.mubr.msk.f32.vlgmr.msra.gmra.mrb[4].mxu0 %vm331_vm10, %v3026_v19 }
 0xb82   :  { %2566 = vmatpush3.bf16.msra.mxu0 %v2844_v8  ;;  %2383 = vmatprep.mubr.msk.f32.mxu0 %vm2786_vm0, %v2787_v14 }
 0xb83   :  { %2567 = vmatprep.subr.bf16.mxu0 %v2785_v2 }
 0xb86   :  { %2569 = vmatpush3.bf16.msra.mxu0 %v2853_v12 }
 0xb87   :  { %2576 = vmatprep.subr.bf16.mxu0 %v2785_v2 }
 0xc54   :  { %v801_v20 = vpop.f32.mrb[4].mxu0 }
 0xc55   :  { %v805_v21 = vadd.f32 %v801_v20, %v2969_v1  ;;  %v2363_v22 = vpop.f32.mrb[5].mxu0 }
 0xc57   :  { %2688 = vtanh.f32 %v805_v21  ;;  %v2131_v25 = vmul.f32 -1.442695, %v805_v21 }
 0xc59   :  { %2690 = vpow2.f32 %v2131_v25 }
 0xc61   :  { %v2689_v24 = vpop.eup %2688 }
 0xc62   :  { %815 = vrot.lane.b32.xlu0 %v2689_v24, %s2788_s15 }
 0xc63   :  { %v2691_v26 = vpop.eup %2690 }
 0xc64   :  { %v809_v27 = vadd.f32 1.0, %v2691_v26 }
 0xc66   :  { %2692 = vrcp.f32 %v809_v27 }
 0xc70   :  { %v2693_v28 = vpop.eup %2692 }
 0xc71   :  { %v813_v30 = vmul.f32 %v2693_v28, %v723_v16 }
 0xcd4   :  { %v816_v29 = vpop.permute.xlu0 %815 }
 0xcd5   :  { %v818_v23 = vmul.f32 %v2693_v28, %v816_v29 }
 0xcd7   :  { %820 = vrot.lane.b32.xlu1 %v818_v23, %s2789_s16 }
 0xd49   :  { %v821_v31 = vpop.permute.xlu1 %820 }
 0xd4a   :  { %v823_v33 = vadd.f32 %v821_v31, %v813_v30 }
 0xd4c   :  { %2694 = vtanh.f32 %v823_v33 }
 0xd56   :  { %v2695_v1 = vpop.eup %2694 }
 0xd57   :  { %826 = vrot.lane.b32.xlu0 %v2695_v1, %s2788_s15 }
 0xdc9   :  { %v827_v34 = vpop.permute.xlu0 %826 }
 0xdca   :  { %v829_v35 = vmul.f32 %v2693_v28, %v827_v34 }
 0xdcc   :  { %831 = vrot.lane.b32.xlu1 %v829_v35, %s2789_s16 }
 0xe3e   :  { %v3041_v36 = vpop.permute.xlu1 %831 }
 0xe3f   :  { %2373 = vmatmul.mubr.msk.f32.vlgmr.msra.gmra.mrb[20].mxu1 %vm331_vm10, %v3041_v36 }
 0xe40   :  { %2572 = vmatpush3.bf16.msra.mxu1 %v2844_v8  ;;  %2394 = vmatprep.mubr.msk.f32.mxu1 %vm2786_vm0, %v2787_v14 }
 0xe41   :  { %2573 = vmatprep.subr.bf16.mxu1 %v2785_v2 }
 0xe44   :  { %2575 = vmatpush3.bf16.msra.mxu1 %v2853_v12 }
 0xe45   :  { %2582 = vmatprep.subr.bf16.mxu1 %v2785_v2 }
 0xf12   :  { %v901_v37 = vpop.f32.mrb[20].mxu1 }
 0xf13   :  { %v905_v38 = vadd.f32 %v2967_v0, %v901_v37  ;;  %v2374_v39 = vpop.f32.mrb[21].mxu1 }
 0xf15   :  { %2696 = vtanh.f32 %v905_v38  ;;  %v2133_v41 = vmul.f32 -1.442695, %v905_v38 }
 0xf17   :  { %2698 = vpow2.f32 %v2133_v41 }
 0xf1f   :  { %v2697_v40 = vpop.eup %2696 }
 0xf20   :  { %915 = vrot.lane.b32.xlu0 %v2697_v40, %s2788_s15 }
 0xf21   :  { %v2699_v8 = vpop.eup %2698 }
 0xf22   :  { %v909_v42 = vadd.f32 1.0, %v2699_v8 }
 0xf24   :  { %2700 = vrcp.f32 %v909_v42 }
 0xf2e   :  { %v2701_v43 = vpop.eup %2700 }
 0xf2f   :  { %v913_v12 = vmul.f32 %v2701_v43, %v823_v33 }
 0xf92   :  { %v916_v44 = vpop.permute.xlu0 %915 }
 0xf93   :  { %v918_v45 = vmul.f32 %v2701_v43, %v916_v44 }
 0xf95   :  { %920 = vrot.lane.b32.xlu1 %v918_v45, %s2789_s16 }
0x1007   :  { %v921_v46 = vpop.permute.xlu1 %920 }
0x1008   :  { %v923_v47 = vadd.f32 %v921_v46, %v913_v12 }
0x100a   :  { %2702 = vtanh.f32 %v923_v47 }
0x1014   :  { %v2703_v0 = vpop.eup %2702 }
0x1015   :  { %926 = vrot.lane.b32.xlu0 %v2703_v0, %s2788_s15 }
0x1087   :  { %v927_v48 = vpop.permute.xlu0 %926 }
0x1088   :  { %v929_v50 = vmul.f32 %v2701_v43, %v927_v48 }
0x108a   :  { %931 = vrot.lane.b32.xlu1 %v929_v50, %s2789_s16 }
0x10fc   :  { %v3070_v56 = vpop.permute.xlu1 %931 }
0x10fd   :  { %2384 = vmatmul.mubr.msk.f32.vlgmr.msra.gmra.mrb[6].mxu0 %vm331_vm10, %v3070_v56 }
0x10fe   :  { %2578 = vmatpush3.bf16.msra.mxu0 %v3062_v53  ;;  %2405 = vmatprep.mubr.msk.f32.mxu0 %vm2786_vm0, %v2787_v14 }
0x10ff   :  { %2579 = vmatprep.subr.bf16.mxu0 %v2785_v2 }
0x1102   :  { %2581 = vmatpush3.bf16.msra.mxu0 %v3075_v57 }
0x1103   :  { %2588 = vmatprep.subr.bf16.mxu0 %v2785_v2 }
0x1105   :  { %2406 = vmatmul.mubr.f32.vlgmr.msra.gmra.mrb[8].mxu0 %v2787_v14 }
0x1106   :  { %2590 = vmatpush3.bf16.msra.mxu0 %v3062_v53  ;;  %2427 = vmatprep.mubr.msk.f32.mxu0 %vm2786_vm0, %v2787_v14 }
0x1107   :  { %2591 = vmatprep.subr.bf16.mxu0 %v2785_v2 }
0x110a   :  { %2593 = vmatpush3.bf16.msra.mxu0 %v3075_v57 }
0x110b   :  { %2600 = vmatprep.subr.bf16.mxu0 %v2785_v2 }
0x11d0   :  { %v1001_v58 = vpop.f32.mrb[6].mxu0 }
0x11d1   :  { %v1005_v59 = vadd.f32 %v1001_v58, %v2973_v4  ;;  %v2385_v60 = vpop.f32.mrb[7].mxu0 }
0x11d3   :  { %2704 = vtanh.f32 %v1005_v59  ;;  %v2135_v20 = vmul.f32 -1.442695, %v1005_v59 }
0x11d8   :  { %v1196_v63 = vpop.f32.mrb[8].mxu0 }
0x11d9   :  { %v1200_v16 = vadd.f32 %v2987_v13, %v1196_v63  ;;  %v2407_v62 = vpop.f32.mrb[9].mxu0 }
0x11db   :  { %2706 = vtanh.f32 %v1200_v16  ;;  %v2138_v21 = vmul.f32 -1.442695, %v1200_v16 }
0x11dc   :  { %2708 = vpow2.f32 %v2135_v20 }
0x11dd   :  { %v2705_v17 = vpop.eup %2704  ;;  %2710 = vpow2.f32 %v2138_v21 }
0x11de   :  { %1015 = vrot.lane.b32.xlu0 %v2705_v17, %s2788_s15 }
0x11e5   :  { %v2707_v18 = vpop.eup %2706 }
0x11e6   :  { %1210 = vrot.lane.b32.xlu1 %v2707_v18, %s2788_s15  ;;  %v2709_v22 = vpop.eup %2708 }
0x11e7   :  { %v1009_v24 = vadd.f32 1.0, %v2709_v22  ;;  %v2711_v4 = vpop.eup %2710 }
0x11e8   :  { %v1204_v25 = vadd.f32 1.0, %v2711_v4 }
0x11e9   :  { %2712 = vrcp.f32 %v1009_v24 }
0x11ea   :  { %2714 = vrcp.f32 %v1204_v25 }
0x11f3   :  { %v2713_v26 = vpop.eup %2712 }
0x11f4   :  { %v2715_v28 = vpop.eup %2714  ;;  %v1013_v30 = vmul.f32 %v2713_v26, %v923_v47 }
0x11f5   :  { %v1208_v1 = vmul.f32 0.0, %v2715_v28 }
0x1250   :  { %v1016_v13 = vpop.permute.xlu0 %1015 }
0x1251   :  { %v1018_v27 = vmul.f32 %v2713_v26, %v1016_v13 }
0x1253   :  { %1020 = vrot.lane.b32.xlu0 %v1018_v27, %s2789_s16 }
0x1258   :  { %v1211_v29 = vpop.permute.xlu1 %1210 }
0x1259   :  { %v1213_v23 = vmul.f32 %v2715_v28, %v1211_v29 }
0x125b   :  { %1215 = vrot.lane.b32.xlu1 %v1213_v23, %s2789_s16 }
0x12c5   :  { %v1021_v31 = vpop.permute.xlu0 %1020 }
0x12c6   :  { %v3095_v33 = vadd.f32 %v1021_v31, %v1013_v30 }
0x12c8   :  { %2716 = vtanh.f32 %v3095_v33 }
0x12cd   :  { %v1216_v34 = vpop.permute.xlu1 %1215 }
0x12ce   :  { %v1218_v35 = vadd.f32 %v1216_v34, %v1208_v1 }
0x12d0   :  { %2718 = vtanh.f32 %v1218_v35 }
0x12d2   :  { %v2717_v37 = vpop.eup %2716 }
0x12d3   :  { %1026 = vrot.lane.b32.xlu0 %v2717_v37, %s2788_s15 }
0x12da   :  { %v2719_v38 = vpop.eup %2718 }
0x12db   :  { %1221 = vrot.lane.b32.xlu1 %v2719_v38, %s2788_s15 }
0x1345   :  { %v1027_v39 = vpop.permute.xlu0 %1026 }
0x1346   :  { %v1029_v40 = vmul.f32 %v2713_v26, %v1027_v39 }
0x1348   :  { %1031 = vrot.lane.b32.xlu0 %v1029_v40, %s2789_s16 }
0x134d   :  { %v1222_v41 = vpop.permute.xlu1 %1221 }
0x134e   :  { %v3101_v8 = vmul.f32 %v2715_v28, %v1222_v41 }
0x1350   :  { %1226 = vrot.lane.b32.xlu1 %v3101_v8, %s2789_s16 }
0x13ba   :  { %v3105_v42 = vpop.permute.xlu0 %1031 }
0x13bb   :  { %2395 = vmatmul.mubr.msk.f32.vlgmr.msra.gmra.mrb[22].mxu1 %vm331_vm10, %v3105_v42 }
0x13bc   :  { %2584 = vmatpush3.bf16.msra.mxu1 %v3062_v53  ;;  %2416 = vmatprep.mubr.msk.f32.mxu1 %vm2786_vm0, %v2787_v14 }
0x13bd   :  { %2585 = vmatprep.subr.bf16.mxu1 %v2785_v2 }
0x13c0   :  { %2587 = vmatpush3.bf16.msra.mxu1 %v3075_v57 }
0x13c1   :  { %2594 = vmatprep.subr.bf16.mxu1 %v2785_v2 }
0x13c2   :  { %v1227_v43 = vpop.permute.xlu1 %1226 }
0x13c3   :  { %2417 = vmatmul.mubr.msk.f32.vlgmr.msra.gmra.mrb[24].mxu1 %vm331_vm10, %v1227_v43 }
0x13c4   :  { %2596 = vmatpush3.bf16.msra.mxu1 %v3062_v53  ;;  %2438 = vmatprep.mubr.msk.f32.mxu1 %vm2786_vm0, %v2787_v14 }
0x13c5   :  { %2597 = vmatprep.subr.bf16.mxu1 %v2785_v2 }
0x13c8   :  { %2599 = vmatpush3.bf16.msra.mxu1 %v3075_v57 }
0x13c9   :  { %2606 = vmatprep.subr.bf16.mxu1 %v2785_v2 }
0x148e   :  { %v1101_v44 = vpop.f32.mrb[22].mxu1 }
0x148f   :  { %v3123_v45 = vadd.f32 %v2971_v3, %v1101_v44  ;;  %v2396_v12 = vpop.f32.mrb[23].mxu1 }
0x1496   :  { %v1296_v46 = vpop.f32.mrb[24].mxu1 }
0x1497   :  { %v1300_v47 = vadd.f32 %v1296_v46, %v2989_v15  ;;  %v2418_v0 = vpop.f32.mrb[25].mxu1 }
0x1499   :  { %2720 = vtanh.f32 %v1300_v47  ;;  %v2140_v50 = vmul.f32 -1.442695, %v1300_v47 }
0x149b   :  { %2722 = vpow2.f32 %v2140_v50 }
0x14a3   :  { %v2721_v48 = vpop.eup %2720 }
0x14a4   :  { %1310 = vrot.lane.b32.xlu0 %v2721_v48, %s2788_s15 }
0x14a5   :  { %v2723_v51 = vpop.eup %2722 }
0x14a6   :  { %v1304_v52 = vadd.f32 1.0, %v2723_v51 }
0x14a8   :  { %2724 = vrcp.f32 %v1304_v52 }
0x14b2   :  { %v2725_v54 = vpop.eup %2724 }
0x14b3   :  { %v1308_v3 = vmul.f32 %v2725_v54, %v1218_v35 }
0x1516   :  { %v1311_v55 = vpop.permute.xlu0 %1310 }
0x1517   :  { %v1313_v58 = vmul.f32 %v2725_v54, %v1311_v55 }
0x1519   :  { %1315 = vrot.lane.b32.xlu1 %v1313_v58, %s2789_s16 }
0x158b   :  { %v1316_v59 = vpop.permute.xlu1 %1315 }
0x158c   :  { %v1318_v60 = vadd.f32 %v1316_v59, %v1308_v3 }
0x158e   :  { %2726 = vtanh.f32 %v1318_v60 }
0x1598   :  { %v2727_v15 = vpop.eup %2726 }
0x1599   :  { %1321 = vrot.lane.b32.xlu0 %v2727_v15, %s2788_s15 }
0x160b   :  { %v1322_v63 = vpop.permute.xlu0 %1321 }
0x160c   :  { %v3129_v16 = vmul.f32 %v2725_v54, %v1322_v63 }
0x160e   :  { %1326 = vrot.lane.b32.xlu1 %v3129_v16, %s2789_s16 }
0x1680   :  { %v1327_v62 = vpop.permute.xlu1 %1326 }
0x1681   :  { %2428 = vmatmul.mubr.msk.f32.vlgmr.msra.gmra.mrb[10].mxu0 %vm331_vm10, %v1327_v62 }
0x1682   :  { %2602 = vmatpush3.bf16.msra.mxu0 %v3062_v53  ;;  %2449 = vmatprep.mubr.msk.f32.mxu0 %vm2786_vm0, %v2787_v14 }
0x1683   :  { %2603 = vmatprep.subr.bf16.mxu0 %v2785_v2 }
0x1686   :  { %2605 = vmatpush3.bf16.msra.mxu0 %v3075_v57 }
0x1687   :  { %2612 = vmatprep.subr.bf16.mxu0 %v2785_v2 }
0x1754   :  { %v1396_v17 = vpop.f32.mrb[10].mxu0 }
0x1755   :  { %v1400_v18 = vadd.f32 %v2983_v10, %v1396_v17  ;;  %v2429_v20 = vpop.f32.mrb[11].mxu0 }
0x1757   :  { %2728 = vtanh.f32 %v1400_v18  ;;  %v2142_v22 = vmul.f32 -1.442695, %v1400_v18 }
0x1759   :  { %2730 = vpow2.f32 %v2142_v22 }
0x1761   :  { %v2729_v21 = vpop.eup %2728 }
0x1762   :  { %1410 = vrot.lane.b32.xlu0 %v2729_v21, %s2788_s15 }
0x1763   :  { %v2731_v24 = vpop.eup %2730 }
0x1764   :  { %v1404_v4 = vadd.f32 1.0, %v2731_v24 }
0x1766   :  { %2732 = vrcp.f32 %v1404_v4 }
0x1770   :  { %v2733_v25 = vpop.eup %2732 }
0x1771   :  { %v1408_v27 = vmul.f32 %v2733_v25, %v1318_v60 }
0x17d4   :  { %v1411_v26 = vpop.permute.xlu0 %1410 }
0x17d5   :  { %v1413_v13 = vmul.f32 %v2733_v25, %v1411_v26 }
0x17d7   :  { %1415 = vrot.lane.b32.xlu1 %v1413_v13, %s2789_s16 }
0x1849   :  { %v1416_v28 = vpop.permute.xlu1 %1415 }
0x184a   :  { %v1418_v29 = vadd.f32 %v1416_v28, %v1408_v27 }
0x184c   :  { %2734 = vtanh.f32 %v1418_v29 }
0x1856   :  { %v2735_v10 = vpop.eup %2734 }
0x1857   :  { %1421 = vrot.lane.b32.xlu0 %v2735_v10, %s2788_s15 }
0x18c9   :  { %v1422_v23 = vpop.permute.xlu0 %1421 }
0x18ca   :  { %v3144_v30 = vmul.f32 %v2733_v25, %v1422_v23 }
0x18cc   :  { %1426 = vrot.lane.b32.xlu1 %v3144_v30, %s2789_s16 }
0x193e   :  { %v1427_v31 = vpop.permute.xlu1 %1426 }
0x193f   :  { %2439 = vmatmul.mubr.msk.f32.vlgmr.msra.gmra.mrb[26].mxu1 %vm331_vm10, %v1427_v31 }
0x1940   :  { %2608 = vmatpush3.bf16.msra.mxu1 %v3062_v53  ;;  %2460 = vmatprep.mubr.msk.f32.mxu1 %vm2786_vm0, %v2787_v14 }
0x1941   :  { %2609 = vmatprep.subr.bf16.mxu1 %v2785_v2 }
0x1944   :  { %2611 = vmatpush3.bf16.msra.mxu1 %v3075_v57 }
0x1945   :  { %2618 = vmatprep.subr.bf16.mxu1 %v2785_v2 }
0x1a12   :  { %v1496_v1 = vpop.f32.mrb[26].mxu1 }
0x1a13   :  { %v1500_v34 = vadd.f32 %v1496_v1, %v2985_v11  ;;  %v2440_v35 = vpop.f32.mrb[27].mxu1 }
0x1a15   :  { %2736 = vtanh.f32 %v1500_v34  ;;  %v2144_v38 = vmul.f32 -1.442695, %v1500_v34 }
0x1a17   :  { %2738 = vpow2.f32 %v2144_v38 }
0x1a1f   :  { %v2737_v37 = vpop.eup %2736 }
0x1a20   :  { %1510 = vrot.lane.b32.xlu0 %v2737_v37, %s2788_s15 }
0x1a21   :  { %v2739_v39 = vpop.eup %2738 }
0x1a22   :  { %v1504_v40 = vadd.f32 1.0, %v2739_v39 }
0x1a24   :  { %2740 = vrcp.f32 %v1504_v40 }
0x1a2e   :  { %v2741_v41 = vpop.eup %2740 }
0x1a2f   :  { %v1508_v12 = vmul.f32 %v2741_v41, %v1418_v29 }
0x1a92   :  { %v1511_v43 = vpop.permute.xlu0 %1510 }
0x1a93   :  { %v1513_v44 = vmul.f32 %v2741_v41, %v1511_v43 }
0x1a95   :  { %1515 = vrot.lane.b32.xlu1 %v1513_v44, %s2789_s16 }
0x1b07   :  { %v1516_v46 = vpop.permute.xlu1 %1515 }
0x1b08   :  { %v1518_v47 = vadd.f32 %v1516_v46, %v1508_v12 }
0x1b0a   :  { %2742 = vtanh.f32 %v1518_v47 }
0x1b14   :  { %v2743_v11 = vpop.eup %2742 }
0x1b15   :  { %1521 = vrot.lane.b32.xlu0 %v2743_v11, %s2788_s15 }
0x1b87   :  { %v1522_v0 = vpop.permute.xlu0 %1521 }
0x1b88   :  { %v3159_v48 = vmul.f32 %v2741_v41, %v1522_v0 }
0x1b8a   :  { %1526 = vrot.lane.b32.xlu1 %v3159_v48, %s2789_s16 }
0x1bfc   :  { %v1527_v50 = vpop.permute.xlu1 %1526 }
0x1bfd   :  { %2450 = vmatmul.mubr.msk.f32.vlgmr.msra.gmra.mrb[12].mxu0 %vm331_vm10, %v1527_v50 }
0x1bfe   :  { %2614 = vmatpush3.bf16.msra.mxu0 %v3062_v53  ;;  %2471 = vmatprep.mubr.msk.f32.mxu0 %vm2786_vm0, %v2787_v14 }
0x1bff   :  { %2615 = vmatprep.subr.bf16.mxu0 %v2785_v2 }
0x1c02   :  { %2617 = vmatpush3.bf16.msra.mxu0 %v3075_v57 }
0x1c03   :  { %2624 = vmatprep.subr.bf16.mxu0 %v2785_v2 }
0x1cd0   :  { %v1596_v51 = vpop.f32.mrb[12].mxu0 }
0x1cd1   :  { %v1600_v52 = vadd.f32 %v2979_v7, %v1596_v51  ;;  %v2451_v54 = vpop.f32.mrb[13].mxu0  ;;  %v2137_v51 = vmul.f32 -1.442695, %v3123_v45 }
0x1cd3   :  { %2744 = vtanh.f32 %v1600_v52  ;;  %v2146_v58 = vmul.f32 -1.442695, %v1600_v52 }
0x1cd5   :  { %2746 = vpow2.f32 %v2146_v58 }
0x1cdd   :  { %v2745_v55 = vpop.eup %2744 }
0x1cde   :  { %1610 = vrot.lane.b32.xlu0 %v2745_v55, %s2788_s15 }
0x1cdf   :  { %v2747_v3 = vpop.eup %2746 }
0x1ce0   :  { %v1604_v59 = vadd.f32 1.0, %v2747_v3 }
0x1ce2   :  { %2748 = vrcp.f32 %v1604_v59 }
0x1cec   :  { %v2749_v60 = vpop.eup %2748 }
0x1ced   :  { %v1608_v62 = vmul.f32 %v2749_v60, %v1518_v47 }
0x1d50   :  { %v1611_v15 = vpop.permute.xlu0 %1610 }
0x1d51   :  { %v1613_v63 = vmul.f32 %v2749_v60, %v1611_v15 }
0x1d53   :  { %1615 = vrot.lane.b32.xlu1 %v1613_v63, %s2789_s16 }
0x1dc5   :  { %v1616_v17 = vpop.permute.xlu1 %1615 }
0x1dc6   :  { %v1618_v18 = vadd.f32 %v1616_v17, %v1608_v62 }
0x1dc8   :  { %2750 = vtanh.f32 %v1618_v18 }
0x1dd2   :  { %v2751_v7 = vpop.eup %2750 }
0x1dd3   :  { %1621 = vrot.lane.b32.xlu0 %v2751_v7, %s2788_s15 }
0x1e45   :  { %v1622_v20 = vpop.permute.xlu0 %1621 }
0x1e46   :  { %v3174_v21 = vmul.f32 %v2749_v60, %v1622_v20 }
0x1e48   :  { %1626 = vrot.lane.b32.xlu1 %v3174_v21, %s2789_s16 }
0x1eba   :  { %v1627_v22 = vpop.permute.xlu1 %1626 }
0x1ebb   :  { %2461 = vmatmul.mubr.msk.f32.vlgmr.msra.gmra.mrb[28].mxu1 %vm331_vm10, %v1627_v22 }
0x1ebc   :  { %2620 = vmatpush3.bf16.msra.mxu1 %v3062_v53  ;;  %2482 = vmatprep.mubr.msk.f32.mxu1 %vm2786_vm0, %v2787_v14 }
0x1ebd   :  { %2621 = vmatprep.subr.bf16.mxu1 %v2785_v2 }
0x1ec0   :  { %2623 = vmatpush3.bf16.msra.mxu1 %v3075_v57 }
0x1f8e   :  { %v1696_v24 = vpop.f32.mrb[28].mxu1 }
0x1f8f   :  { %v1700_v4 = vadd.f32 %v1696_v24, %v2981_v9  ;;  %v2462_v25 = vpop.f32.mrb[29].mxu1 }
0x1f91   :  { %2752 = vtanh.f32 %v1700_v4  ;;  %v2148_v13 = vmul.f32 -1.442695, %v1700_v4 }
0x1f93   :  { %2754 = vpow2.f32 %v2148_v13 }
0x1f9b   :  { %v2753_v26 = vpop.eup %2752 }
0x1f9c   :  { %1710 = vrot.lane.b32.xlu0 %v2753_v26, %s2788_s15 }
0x1f9d   :  { %v2755_v27 = vpop.eup %2754 }
0x1f9e   :  { %v1704_v28 = vadd.f32 1.0, %v2755_v27 }
0x1fa0   :  { %2756 = vrcp.f32 %v1704_v28 }
0x1faa   :  { %v2757_v53 = vpop.eup %2756 }
0x1fab   :  { %v1708_v23 = vmul.f32 %v2757_v53, %v1618_v18 }
0x200e   :  { %v1711_v29 = vpop.permute.xlu0 %1710 }
0x200f   :  { %v1713_v10 = vmul.f32 %v2757_v53, %v1711_v29 }
0x2011   :  { %1715 = vrot.lane.b32.xlu1 %v1713_v10, %s2789_s16 }
0x2083   :  { %v1716_v57 = vpop.permute.xlu1 %1715 }
0x2084   :  { %v1718_v31 = vadd.f32 %v1716_v57, %v1708_v23 }
0x2086   :  { %2758 = vtanh.f32 %v1718_v31 }
0x2090   :  { %v2759_v9 = vpop.eup %2758 }
0x2091   :  { %1721 = vrot.lane.b32.xlu0 %v2759_v9, %s2788_s15 }
0x2103   :  { %v1722_v1 = vpop.permute.xlu0 %1721 }
0x2104   :  { %v3188_v34 = vmul.f32 %v2757_v53, %v1722_v1  ;;  %v1990_v1 = vld [vmem:[%s3354_s3] sm:$0xff] }
0x2106   :  { %1726 = vrot.lane.b32.xlu1 %v3188_v34, %s2789_s16 }
0x2178   :  { %v1727_v35 = vpop.permute.xlu1 %1726 }
0x2179   :  { %2472 = vmatmul.mubr.msk.f32.vlgmr.msra.gmra.mrb[14].mxu0 %vm331_vm10, %v1727_v35  ;;  %v1991_v35 = vld [vmem:[%s3354_s3 + $0x8] sm:$0xff] }
0x217a   :  { %2517 = vmatprep.mubr.msk.f32.mxu0 %vm2786_vm0, %v2787_v14 }
0x224c   :  { %v1796_v37 = vpop.f32.mrb[14].mxu0 }
0x224d   :  { %v1800_v38 = vadd.f32 %v2975_v5, %v1796_v37  ;;  %v2473_v39 = vpop.f32.mrb[15].mxu0  ;;  %v1992_v37 = vld [vmem:[%s3354_s3 + $0x10] sm:$0xff] }
0x224e   :  { %v1993_v39 = vld [vmem:[%s3354_s3 + $0x18] sm:$0xff] }
0x224f   :  { %2760 = vtanh.f32 %v1800_v38  ;;  %v2150_v41 = vmul.f32 -1.442695, %v1800_v38  ;;  %v2625_v38 = vpack.c.bf16 %v1991_v35, %v1990_v1 }
0x2251   :  { %2762 = vpow2.f32 %v2150_v41  ;;  %2626 = vmatpush3.bf16.msra.mxu0 %v2625_v38  ;;  %v1994_v41 = vld [vmem:[%s3354_s3 + $0x20] sm:$0xff] }
0x2252   :  { %2627 = vmatprep.subr.bf16.mxu0 %v2785_v2 }
0x2259   :  { %v2761_v40 = vpop.eup %2760 }
0x225a   :  { %1810 = vrot.lane.b32.xlu0 %v2761_v40, %s2788_s15  ;;  %v2628_v40 = vpack.c.bf16 %v1993_v39, %v1992_v37 }
0x225b   :  { %v2763_v43 = vpop.eup %2762 }
0x225c   :  { %v1804_v44 = vadd.f32 1.0, %v2763_v43  ;;  %v1995_v43 = vld [vmem:[%s3354_s3 + $0x28] sm:$0xff]  ;;  %2629 = vmatpush3.bf16.msra.mxu0 %v2628_v40 }
0x225d   :  { %2630 = vmatprep.subr.bf16.mxu0 %v2785_v2 }
0x225e   :  { %2764 = vrcp.f32 %v1804_v44  ;;  %v2631_v44 = vpack.c.bf16 %v1995_v43, %v1994_v41 }
0x2260   :  { %2632 = vmatpush3.bf16.msra.mxu0 %v2631_v44 }
0x2261   :  { %2633 = vmatprep.subr.bf16.mxu0 %v2785_v2 }
0x2268   :  { %v2765_v12 = vpop.eup %2764 }
0x2269   :  { %v1808_v11 = vmul.f32 %v2765_v12, %v1718_v31 }
0x22cc   :  { %v1811_v46 = vpop.permute.xlu0 %1810 }
0x22cd   :  { %v1813_v47 = vmul.f32 %v2765_v12, %v1811_v46  ;;  %v1997_v46 = vld [vmem:[%s3354_s3 + $0x38] sm:$0xff] }
0x22cf   :  { %1815 = vrot.lane.b32.xlu1 %v1813_v47, %s2789_s16 }
0x2341   :  { %v1816_v14 = vpop.permute.xlu1 %1815 }
0x2342   :  { %v3198_v0 = vadd.f32 %v1816_v14, %v1808_v11  ;;  %v1998_v11 = vld [vmem:[%s3354_s3 + $0x40] sm:$0xff]  ;;  %v1999_v14 = vld [vmem:[%s3354_s3 + $0x48] sm:$0xff] }
0x2344   :  { %2766 = vtanh.f32 %v3198_v0 }
0x2345   :  { %2768 = vtanh.f32 %v3123_v45 }
0x2346   :  { %2770 = vpow2.f32 %v2137_v51 }
0x234e   :  { %v2767_v5 = vpop.eup %2766 }
0x234f   :  { %1821 = vrot.lane.b32.xlu0 %v2767_v5, %s2788_s15  ;;  %v2769_v50 = vpop.eup %2768  ;;  %v2000_v5 = vld [vmem:[%s3354_s3 + $0x50] sm:$0xff] }
0x2350   :  { %v2771_v52 = vpop.eup %2770 }
0x2351   :  { %v1109_v54 = vadd.f32 1.0, %v2771_v52  ;;  %v2002_v52 = vld [vmem:[%s3354_s3 + $0x60] sm:$0xff] }
0x2353   :  { %1115 = vrot.lane.b32.xlu0 %v2769_v50, %s2788_s15  ;;  %2772 = vrcp.f32 %v1109_v54  ;;  %v2001_v50 = vld [vmem:[%s3354_s3 + $0x58] sm:$0xff]  ;;  %v2003_v54 = vld [vmem:[%s3354_s3 + $0x68] sm:$0xff] }
0x2354   :  { %v2640_v51 = vpack.c.bf16 %v2001_v50, %v2000_v5 }
0x235d   :  { %v2773_v3 = vpop.eup %2772 }
0x235e   :  { %v1113_v63 = vmul.f32 %v2773_v3, %v3095_v33 }
0x23c1   :  { %v1822_v55 = vpop.permute.xlu0 %1821 }
0x23c2   :  { %v1824_v58 = vmul.f32 %v2765_v12, %v1822_v55  ;;  %v1996_v12 = vld [vmem:[%s3354_s3 + $0x30] sm:$0xff]  ;;  %v2643_v55 = vpack.c.bf16 %v2003_v54, %v2002_v52 }
0x23c3   :  { %v2634_v47 = vpack.c.bf16 %v1997_v46, %v1996_v12 }
0x23c4   :  { %1826 = vrot.lane.b32.xlu1 %v1824_v58, %s2789_s16 }
0x23c5   :  { %v1116_v59 = vpop.permute.xlu0 %1115  ;;  %2635 = vmatpush3.bf16.msra.mxu0 %v2634_v47 }
0x23c6   :  { %v1118_v60 = vmul.f32 %v2773_v3, %v1116_v59  ;;  %2636 = vmatprep.subr.bf16.mxu0 %v2785_v2 }
0x23c8   :  { %1120 = vrot.lane.b32.xlu0 %v1118_v60, %s2789_s16 }
0x2436   :  { %v1827_v15 = vpop.permute.xlu1 %1826 }
0x2437   :  { %2483 = vmatmul.mubr.msk.f32.vlgmr.msra.gmra.mrb[30].mxu1 %vm331_vm10, %v1827_v15 }
0x243a   :  { %v1121_v62 = vpop.permute.xlu0 %1120 }
0x243b   :  { %v1123_v45 = vadd.f32 %v1121_v62, %v1113_v63 }
0x243d   :  { %2774 = vtanh.f32 %v1123_v45 }
0x2447   :  { %v2775_v17 = vpop.eup %2774 }
0x2448   :  { %1126 = vrot.lane.b32.xlu0 %v2775_v17, %s2788_s15 }
0x24ba   :  { %v1127_v18 = vpop.permute.xlu0 %1126 }
0x24bb   :  { %v1129_v7 = vmul.f32 %v2773_v3, %v1127_v18  ;;  %v2005_v3 = vld [vmem:[%s3354_s3 + $0x78] sm:$0xff] }
0x24bd   :  { %1926 = vrot.lane.b32.xlu0 %v1129_v7, %s2789_s16 }
0x24c1   :  { %1979 = vrot.lane.b32.xlu0 %v1123_v45, %s2789_s16 }
0x24c5   :  { %1939 = vrot.lane.b32.xlu0 %v1824_v58, %s2788_s15  ;;  %v2004_v58 = vld [vmem:[%s3354_s3 + $0x70] sm:$0xff] }
0x24c6   :  { %v2646_v59 = vpack.c.bf16 %v2005_v3, %v2004_v58 }
0x24c9   :  { %1943 = vrot.lane.b32.xlu0 %v3174_v21, %s2788_s15 }
0x24cd   :  { %1947 = vrot.lane.b32.xlu0 %v3144_v30, %s2788_s15 }
0x24d1   :  { %1951 = vrot.lane.b32.xlu0 %v3101_v8, %s2788_s15 }
0x250a   :  { %v1896_v33 = vpop.f32.mrb[30].mxu1 }
0x250b   :  { %v1900_v20 = vadd.f32 %v1896_v33, %v2977_v6  ;;  %v2484_v22 = vpop.f32.mrb[31].mxu1 }
0x250d   :  { %2776 = vtanh.f32 %v1900_v20 }
0x2517   :  { %v2777_v24 = vpop.eup %2776 }
0x2518   :  { %1910 = vrot.lane.b32.xlu1 %v2777_v24, %s2788_s15 }
0x252f   :  { %v3221_v4 = vpop.permute.xlu0 %1926 }
0x2533   :  { %v3223_v25 = vpop.permute.xlu0 %1979 }
0x2537   :  { %v1940_v21 = vpop.permute.xlu0 %1939 }
0x2538   :  { %v1962_v30 = vsel %vm331_vm10, %v2997_v32, %v1940_v21 }
0x2539   :  { %1971 = vst.msk [vmem:[%s3353_s5 + $0x8] sm:$0xff] %vm1969_vm11, %v1962_v30 }
0x253b   :  { %v1944_v6 = vpop.permute.xlu0 %1943 }
0x253c   :  { %v1964_v8 = vsel %vm331_vm10, %v3026_v19, %v1944_v6  ;;  %v2152_v19 = vmul.f32 -1.442695, %v1900_v20 }
0x253d   :  { %1973 = vst.msk [vmem:[%s3353_s5 + $0x18] sm:$0xff] %vm1969_vm11, %v1964_v8 }
0x253e   :  { %2778 = vpow2.f32 %v2152_v19 }
0x253f   :  { %v1948_v26 = vpop.permute.xlu0 %1947 }
0x2540   :  { %v1966_v13 = vsel %vm331_vm10, %v3070_v56, %v1948_v26 }
0x2541   :  { %1975 = vst.msk [vmem:[%s3353_s5 + $0x28] sm:$0xff] %vm1969_vm11, %v1966_v13 }
0x2543   :  { %v1952_v32 = vpop.permute.xlu0 %1951 }
0x2544   :  { %v1968_v27 = vsel %vm331_vm10, %v3221_v4, %v1952_v32 }
0x2545   :  { %1977 = vst.msk [vmem:[%s3353_s5 + $0x38] sm:$0xff] %vm1969_vm11, %v1968_v27 }
0x2548   :  { %v2779_v28 = vpop.eup %2778 }
0x2549   :  { %v1904_v53 = vadd.f32 1.0, %v2779_v28 }
0x254b   :  { %2780 = vrcp.f32 %v1904_v53 }
0x2555   :  { %v2781_v56 = vpop.eup %2780 }
0x2556   :  { %v1908_v23 = vmul.f32 %v2781_v56, %v3198_v0  ;;  %v2637_v0 = vpack.c.bf16 %v1999_v14, %v1998_v11 }
0x2558   :  { %2638 = vmatpush3.bf16.msra.mxu0 %v2637_v0 }
0x2559   :  { %2639 = vmatprep.subr.bf16.mxu0 %v2785_v2 }
0x255c   :  { %2641 = vmatpush3.bf16.msra.mxu0 %v2640_v51 }
0x255d   :  { %2642 = vmatprep.subr.bf16.mxu0 %v2785_v2 }
0x2560   :  { %2644 = vmatpush3.bf16.msra.mxu0 %v2643_v55 }
0x2561   :  { %2645 = vmatprep.subr.bf16.mxu0 %v2785_v2 }
0x2564   :  { %2647 = vmatpush3.bf16.msra.mxu0 %v2646_v59 }
0x258a   :  { %v1911_v29 = vpop.permute.xlu1 %1910 }
0x258b   :  { %v1913_v10 = vmul.f32 %v2781_v56, %v1911_v29 }
0x258d   :  { %1915 = vrot.lane.b32.xlu1 %v1913_v10, %s2789_s16 }
0x25ff   :  { %v1916_v57 = vpop.permute.xlu1 %1915 }
0x2600   :  { %v1918_v31 = vadd.f32 %v1916_v57, %v1908_v23 }
0x2602   :  { %2782 = vtanh.f32 %v1918_v31 }
0x260c   :  { %v2783_v9 = vpop.eup %2782 }
0x260d   :  { %1921 = vrot.lane.b32.xlu1 %v2783_v9, %s2788_s15 }
0x267f   :  { %v1922_v60 = vpop.permute.xlu1 %1921 }
0x2680   :  { %v1924_v15 = vmul.f32 %v2781_v56, %v1922_v60 }
0x2682   :  { %1937 = vrot.lane.b32.xlu1 %v1924_v15, %s2788_s15 }
0x2686   :  { %1983 = vrot.lane.b32.xlu1 %v1918_v31, %s2788_s15 }
0x268a   :  { %1941 = vrot.lane.b32.xlu1 %v3188_v34, %s2788_s15 }
0x268e   :  { %1945 = vrot.lane.b32.xlu1 %v3159_v48, %s2788_s15 }
0x2692   :  { %1949 = vrot.lane.b32.xlu1 %v3129_v16, %s2788_s15 }
0x26f4   :  { %v1938_v2 = vpop.permute.xlu1 %1937 }
0x26f5   :  { %v1961_v63 = vsel %vm331_vm10, %v2955_v61, %v1938_v2  ;;  %v1986_v62 = vsel %vm331_vm10, %v3221_v4, %v1938_v2 }
0x26f6   :  { %1970 = vst.msk [vmem:[%s3353_s5] sm:$0xff] %vm1969_vm11, %v1961_v63  ;;  %v1987_v34 = vsel %vm1969_vm11, %v1986_v62, %v3223_v25 }
0x26f8   :  { %v1984_v48 = vpop.permute.xlu1 %1983 }
0x26f9   :  { %v1989_v45 = vsel %vm1988_vm12, %v1987_v34, %v1984_v48 }
0x26fa   :  { %2518 = vmatmul.mubr.f32.vlgmr.msra.gmra.mrb[16].mxu0 %v1989_v45 }
0x26fc   :  { %v1942_v16 = vpop.permute.xlu1 %1941 }
0x26fd   :  { %v1963_v17 = vsel %vm331_vm10, %v3011_v49, %v1942_v16  ;;  %v2153_v49 = vld [vmem:[%s3355_s4] ss:$0 sm:$0xff] }
0x26fe   :  { %1972 = vst.msk [vmem:[%s3353_s5 + $0x10] sm:$0xff] %vm1969_vm11, %v1963_v17 }
0x2700   :  { %v1946_v61 = vpop.permute.xlu1 %1945 }
0x2701   :  { %v1965_v18 = vsel %vm331_vm10, %v3041_v36, %v1946_v61 }
0x2702   :  { %1974 = vst.msk [vmem:[%s3353_s5 + $0x20] sm:$0xff] %vm1969_vm11, %v1965_v18 }
0x2704   :  { %v1950_v7 = vpop.permute.xlu1 %1949 }
0x2705   :  { %v1967_v33 = vsel %vm331_vm10, %v3105_v42, %v1950_v7 }
0x2706   :  { %1976 = vst.msk [vmem:[%s3353_s5 + $0x30] sm:$0xff] %vm1969_vm11, %v1967_v33 }
0x27cd   :  { %v2079_v20 = vpop.f32.mrb[16].mxu0 }
0x27ce   :  { %v2080_v36 = vadd.f32 %v2153_v49, %v2079_v20  ;;  %v2519_v22 = vpop.f32.mrb[17].mxu0 }
0x27d0   :  { %2083 = vst.msk [vmem:[%s3356_s6] sm:$0xff] %vm1969_vm11, %v2080_v36 }

</bundles_post_ra>
